<compile_context>
chip_gen: v7x
topology: tpu7x:2x2x1
jax: 0.10.0
libtpu: 0.0.40
codegen_flags: <defaults>
</compile_context>

<pallas_src>
import jax
import jax.numpy as jnp
from jax.experimental import pallas as pl
from jax.experimental.pallas import tpu as pltpu

D_IN = 8 * 8 * 25          # 1600 flattened features
H = 512
D_OUT = 2
D_OUT_PAD = 128            # lane-dense output slab (>= one full lane tile)


def _round_up(x, m):
    return (x + m - 1) // m * m


def _choose_tm(batch):
    """Batch tile size.

    - B <= 128: a single tile (rounded to the 8-sublane granule).
    - B  > 128: split into >=2 grid steps (v7x megacore) while capping at 512
      rows so the working set fits VMEM on every generation.
    """
    if batch <= 128:
        return _round_up(max(batch, 1), 8)
    return min(512, _round_up(pl.cdiv(batch, 2), 8))


def mlp_kernel(x_ref, w1_ref, b1_ref, w2_ref, b2_ref, w3_ref, b3_ref, o_ref):
    # x arrives as f32 (no wrapper-side cast/pad pass); cast to bf16 for the MXU.
    x = x_ref[...].astype(jnp.bfloat16)
    # Layer 1: Linear(1600 -> 512) + ReLU   (bf16 operands, f32 accumulate)
    h1 = jnp.dot(x, w1_ref[...], preferred_element_type=jnp.float32)
    h1 = jnp.maximum(h1 + b1_ref[...], 0.0)
    # Layer 2: Linear(512 -> 512) + ReLU
    h2 = jnp.dot(h1.astype(jnp.bfloat16), w2_ref[...],
                 preferred_element_type=jnp.float32)
    h2 = jnp.maximum(h2 + b2_ref[...], 0.0)
    # Layer 3: Linear(512 -> 128(pad)); logits live in columns [:2]
    o = jnp.dot(h2.astype(jnp.bfloat16), w3_ref[...],
                preferred_element_type=jnp.float32)
    o_ref[...] = o + b3_ref[...]


def prepare_params(params):
    """One-time weight prep (call once, reuse for every forward).

    Casts weights to bf16 and pads the 2-wide output layer to a 128-lane slab.
    Biases stay f32 (added after the f32 accumulation).
    """
    w1, b1, w2, b2, w3, b3 = params
    w1_b = w1.astype(jnp.bfloat16)                                   # (1600, 512)
    w2_b = w2.astype(jnp.bfloat16)                                   # (512, 512)
    w3_p = jnp.zeros((H, D_OUT_PAD), jnp.bfloat16).at[:, :D_OUT].set(
        w3.astype(jnp.bfloat16))                                     # (512, 128)
    b3_p = jnp.zeros((1, D_OUT_PAD), jnp.float32).at[:, :D_OUT].set(b3)
    return w1_b, b1, w2_b, b2, w3_p, b3_p


def neural_network_forward(x_nchw, prepared):
    """Forward pass equivalent to NeuralNetwork.forward.

    x_nchw:   (B, 25, 8, 8) float32
    prepared: output of prepare_params (pre-padded bf16 weights, f32 biases)
    returns logits: (B, 2) float32
    """
    w1_b, b1, w2_b, b2, w3_p, b3_p = prepared
    B = x_nchw.shape[0]

    # nn.Flatten(): (B, C, H, W) -> (B, C*H*W), row-major => free reshape.
    x2d = x_nchw.reshape(B, -1)
    assert x2d.shape[1] == D_IN

    TM = _choose_tm(B)
    grid = (pl.cdiv(B, TM),)

    flops = 2 * B * (D_IN * H + H * H + H * D_OUT_PAD)
    bytes_accessed = (B * D_IN * 4                       # x (f32, read once)
                      + (D_IN * H + H * H + H * D_OUT_PAD) * 2   # bf16 weights
                      + (H + H + D_OUT_PAD) * 4          # biases
                      + B * D_OUT_PAD * 4)               # output slab

    out = pl.pallas_call(
        mlp_kernel,
        out_shape=jax.ShapeDtypeStruct((B, D_OUT_PAD), jnp.float32),
        grid_spec=pltpu.PrefetchScalarGridSpec(
            num_scalar_prefetch=0,
            grid=grid,
            in_specs=[
                pl.BlockSpec((TM, D_IN), lambda i: (i, 0)),       # x tile
                pl.BlockSpec((D_IN, H), lambda i: (0, 0)),        # w1 (resident)
                pl.BlockSpec((1, H), lambda i: (0, 0)),           # b1
                pl.BlockSpec((H, H), lambda i: (0, 0)),           # w2
                pl.BlockSpec((1, H), lambda i: (0, 0)),           # b2
                pl.BlockSpec((H, D_OUT_PAD), lambda i: (0, 0)),   # w3
                pl.BlockSpec((1, D_OUT_PAD), lambda i: (0, 0)),   # b3
            ],
            out_specs=pl.BlockSpec((TM, D_OUT_PAD), lambda i: (i, 0)),
        ),
        compiler_params=pltpu.CompilerParams(
            dimension_semantics=("parallel",),
            vmem_limit_bytes=48 * 1024 * 1024,
        ),
        cost_estimate=pl.CostEstimate(
            flops=flops, transcendentals=0, bytes_accessed=bytes_accessed),
    )(x2d, w1_b, b1, w2_b, b2, w3_p, b3_p)

    return out[:, :D_OUT]


def init_params(key):
    """Deterministic init matching the PyTorch layer shapes.

    PyTorch Linear weight is (out, in); we store the transpose (in, out).
    Biases are kept 2-D (1, out) for clean TPU broadcasting. Master copies f32.
    """
    k1, k2, k3, k4, k5, k6 = jax.random.split(key, 6)
    s1 = 1.0 / jnp.sqrt(D_IN)
    s2 = 1.0 / jnp.sqrt(H)
    w1 = jax.random.uniform(k1, (D_IN, H), jnp.float32, -s1, s1)
    b1 = jax.random.uniform(k2, (1, H), jnp.float32, -s1, s1)
    w2 = jax.random.uniform(k3, (H, H), jnp.float32, -s2, s2)
    b2 = jax.random.uniform(k4, (1, H), jnp.float32, -s2, s2)
    w3 = jax.random.uniform(k5, (H, D_OUT), jnp.float32, -s2, s2)
    b3 = jax.random.uniform(k6, (1, D_OUT), jnp.float32, -s2, s2)
    return w1, b1, w2, b2, w3, b3


if __name__ == "__main__":
    key = jax.random.PRNGKey(0)
    k_params, k_x = jax.random.split(key)

    params = init_params(k_params)
    prepared = prepare_params(params)          # one-time weight prep (hoisted)
    jax.block_until_ready(prepared)

    # Small input consistent with the module: flattens to 8*8*25 = 1600 feats.
    x = jax.random.normal(k_x, (2, 25, 8, 8), jnp.float32)

    fwd = jax.jit(neural_network_forward)
    logits = fwd(x, prepared)
    jax.block_until_ready(logits)
    assert logits.shape == (2, 2)

    w1, b1, w2, b2, w3, b3 = params
    xf = x.reshape(x.shape[0], -1)

    # Reference with the same bf16-operand / f32-accumulate arithmetic as the kernel.
    xb = xf.astype(jnp.bfloat16)
    w1b, w2b, w3b = (w.astype(jnp.bfloat16) for w in (w1, w2, w3))
    r = jnp.maximum(jnp.dot(xb, w1b, preferred_element_type=jnp.float32) + b1, 0.0)
    r = jnp.maximum(jnp.dot(r.astype(jnp.bfloat16), w2b,
                            preferred_element_type=jnp.float32) + b2, 0.0)
    ref_bf16 = jnp.dot(r.astype(jnp.bfloat16), w3b,
                       preferred_element_type=jnp.float32) + b3
    assert jnp.allclose(logits, ref_bf16, atol=2e-3, rtol=2e-3)

    # Loose sanity check against the full-f32 PyTorch-equivalent math.
    ref = jnp.maximum(xf @ w1 + b1, 0.0)
    ref = jnp.maximum(ref @ w2 + b2, 0.0)
    ref = ref @ w3 + b3
    assert jnp.allclose(logits, ref, atol=5e-2, rtol=5e-2)

    print("KERNEL_OK")
</pallas_src>

<mosaic_0001>
module attributes {stable_mosaic.version = 11 : i64} {
  func.func @mlp_kernel(%arg0: i32, %arg1: memref<8x1600xf32, #tpu.memory_space<vmem>>, %arg2: memref<1600x512xbf16, #tpu.memory_space<vmem>>, %arg3: memref<1x512xf32, #tpu.memory_space<vmem>>, %arg4: memref<512x512xbf16, #tpu.memory_space<vmem>>, %arg5: memref<1x512xf32, #tpu.memory_space<vmem>>, %arg6: memref<512x128xbf16, #tpu.memory_space<vmem>>, %arg7: memref<1x128xf32, #tpu.memory_space<vmem>>, %arg8: memref<8x128xf32, #tpu.memory_space<vmem>>) attributes {dimension_semantics = [#tpu.dimension_semantics<parallel>], iteration_bounds = array<i64: 1>, scalar_prefetch = 0 : i64, scratch_operands = 0 : i64, tpu.core_type = #tpu.core_type<tc>, window_params = [{transform_indices = @transform_0, window_bounds = array<i64: 8, 1600>}, {pipeline_mode = #tpu.pipeline_mode<synchronous>, transform_indices = @transform_1, window_bounds = array<i64: 1600, 512>}, {pipeline_mode = #tpu.pipeline_mode<synchronous>, transform_indices = @transform_2, window_bounds = array<i64: 1, 512>}, {pipeline_mode = #tpu.pipeline_mode<synchronous>, transform_indices = @transform_3, window_bounds = array<i64: 512, 512>}, {pipeline_mode = #tpu.pipeline_mode<synchronous>, transform_indices = @transform_4, window_bounds = array<i64: 1, 512>}, {pipeline_mode = #tpu.pipeline_mode<synchronous>, transform_indices = @transform_5, window_bounds = array<i64: 512, 128>}, {pipeline_mode = #tpu.pipeline_mode<synchronous>, transform_indices = @transform_6, window_bounds = array<i64: 1, 128>}, {transform_indices = @transform_7, window_bounds = array<i64: 8, 128>}]} {
    %c0 = arith.constant 0 : index
    %c0_0 = arith.constant 0 : index
    %0 = vector.load %arg1[%c0, %c0_0] : memref<8x1600xf32, #tpu.memory_space<vmem>>, vector<8x1600xf32>
    %1 = arith.truncf %0 : vector<8x1600xf32> to vector<8x1600xbf16>
    %c0_1 = arith.constant 0 : index
    %c0_2 = arith.constant 0 : index
    %2 = vector.load %arg2[%c0_1, %c0_2] : memref<1600x512xbf16, #tpu.memory_space<vmem>>, vector<1600x512xbf16>
    %cst = arith.constant dense<0.000000e+00> : vector<8x512xf32>
    %3 = tpu.matmul %1, %2, %cst {dimension_numbers = #tpu.dot_dimension_numbers<[1], [0], [0], [1], [0, 0, 1, 1], [], []>} : vector<8x1600xbf16>, vector<1600x512xbf16>, vector<8x512xf32> -> vector<8x512xf32>
    %c0_3 = arith.constant 0 : index
    %c0_4 = arith.constant 0 : index
    %4 = vector.load %arg3[%c0_3, %c0_4] : memref<1x512xf32, #tpu.memory_space<vmem>>, vector<1x512xf32>
    %5 = vector.broadcast %4 : vector<1x512xf32> to vector<8x512xf32>
    %6 = arith.addf %3, %5 : vector<8x512xf32>
    %cst_5 = arith.constant 0.000000e+00 : f32
    %7 = vector.broadcast %cst_5 : f32 to vector<8x512xf32>
    %8 = arith.maximumf %6, %7 : vector<8x512xf32>
    %9 = arith.truncf %8 : vector<8x512xf32> to vector<8x512xbf16>
    %c0_6 = arith.constant 0 : index
    %c0_7 = arith.constant 0 : index
    %10 = vector.load %arg4[%c0_6, %c0_7] : memref<512x512xbf16, #tpu.memory_space<vmem>>, vector<512x512xbf16>
    %cst_8 = arith.constant dense<0.000000e+00> : vector<8x512xf32>
    %11 = tpu.matmul %9, %10, %cst_8 {dimension_numbers = #tpu.dot_dimension_numbers<[1], [0], [0], [1], [0, 0, 1, 1], [], []>} : vector<8x512xbf16>, vector<512x512xbf16>, vector<8x512xf32> -> vector<8x512xf32>
    %c0_9 = arith.constant 0 : index
    %c0_10 = arith.constant 0 : index
    %12 = vector.load %arg5[%c0_9, %c0_10] : memref<1x512xf32, #tpu.memory_space<vmem>>, vector<1x512xf32>
    %13 = vector.broadcast %12 : vector<1x512xf32> to vector<8x512xf32>
    %14 = arith.addf %11, %13 : vector<8x512xf32>
    %cst_11 = arith.constant 0.000000e+00 : f32
    %15 = vector.broadcast %cst_11 : f32 to vector<8x512xf32>
    %16 = arith.maximumf %14, %15 : vector<8x512xf32>
    %17 = arith.truncf %16 : vector<8x512xf32> to vector<8x512xbf16>
    %c0_12 = arith.constant 0 : index
    %c0_13 = arith.constant 0 : index
    %18 = vector.load %arg6[%c0_12, %c0_13] : memref<512x128xbf16, #tpu.memory_space<vmem>>, vector<512x128xbf16>
    %cst_14 = arith.constant dense<0.000000e+00> : vector<8x128xf32>
    %19 = tpu.matmul %17, %18, %cst_14 {dimension_numbers = #tpu.dot_dimension_numbers<[1], [0], [0], [1], [0, 0, 1, 1], [], []>} : vector<8x512xbf16>, vector<512x128xbf16>, vector<8x128xf32> -> vector<8x128xf32>
    %c0_15 = arith.constant 0 : index
    %c0_16 = arith.constant 0 : index
    %20 = vector.load %arg7[%c0_15, %c0_16] : memref<1x128xf32, #tpu.memory_space<vmem>>, vector<1x128xf32>
    %21 = vector.broadcast %20 : vector<1x128xf32> to vector<8x128xf32>
    %22 = arith.addf %19, %21 : vector<8x128xf32>
    %c0_17 = arith.constant 0 : index
    %c0_18 = arith.constant 0 : index
    %23 = vector.load %arg8[%c0_17, %c0_18] : memref<8x128xf32, #tpu.memory_space<vmem>>, vector<8x128xf32>
    tpu.vector_store %arg8[%c0_17, %c0_18], %22 {strides = array<i32>} : memref<8x128xf32, #tpu.memory_space<vmem>>, vector<8x128xf32>,
    return
  }
  func.func @transform_0(%arg0: i32) -> (i32, i32) {
    %c0_i32 = arith.constant 0 : i32
    %c0_i32_0 = arith.constant 0 : i32
    return %arg0, %c0_i32 : i32, i32
  }
  func.func @transform_1(%arg0: i32) -> (i32, i32) {
    %c0_i32 = arith.constant 0 : i32
    %c0_i32_0 = arith.constant 0 : i32
    %c0_i32_1 = arith.constant 0 : i32
    return %c0_i32, %c0_i32_0 : i32, i32
  }
  func.func @transform_2(%arg0: i32) -> (i32, i32) {
    %c0_i32 = arith.constant 0 : i32
    %c0_i32_0 = arith.constant 0 : i32
    %c0_i32_1 = arith.constant 0 : i32
    return %c0_i32, %c0_i32_0 : i32, i32
  }
  func.func @transform_3(%arg0: i32) -> (i32, i32) {
    %c0_i32 = arith.constant 0 : i32
    %c0_i32_0 = arith.constant 0 : i32
    %c0_i32_1 = arith.constant 0 : i32
    return %c0_i32, %c0_i32_0 : i32, i32
  }
  func.func @transform_4(%arg0: i32) -> (i32, i32) {
    %c0_i32 = arith.constant 0 : i32
    %c0_i32_0 = arith.constant 0 : i32
    %c0_i32_1 = arith.constant 0 : i32
    return %c0_i32, %c0_i32_0 : i32, i32
  }
  func.func @transform_5(%arg0: i32) -> (i32, i32) {
    %c0_i32 = arith.constant 0 : i32
    %c0_i32_0 = arith.constant 0 : i32
    %c0_i32_1 = arith.constant 0 : i32
    return %c0_i32, %c0_i32_0 : i32, i32
  }
  func.func @transform_6(%arg0: i32) -> (i32, i32) {
    %c0_i32 = arith.constant 0 : i32
    %c0_i32_0 = arith.constant 0 : i32
    %c0_i32_1 = arith.constant 0 : i32
    return %c0_i32, %c0_i32_0 : i32, i32
  }
  func.func @transform_7(%arg0: i32) -> (i32, i32) {
    %c0_i32 = arith.constant 0 : i32
    %c0_i32_0 = arith.constant 0 : i32
    return %arg0, %c0_i32 : i32, i32
  }
}

</mosaic_0001>

<bundles_post_ra>
// kernel: neural_network_forward.1
= control target key start
LH: loop header
LB: loop body
LE: loop exit
PB: predicated region body
PF: predicated region fallthrough
CT: control target
= control target key end

     0   :  { %12 = vsyncpa [#allocation3], 0  ;;  %s6584_s0 = inlined_call_operand.vmem [shape: f32[2,1600], index: 0, kind: input, shape index: {}]   ;;  %s6585_s1 = inlined_call_operand.hbm [shape: bf16[1600,512], index: 1, kind: input, shape index: {}]   ;;  %s6586_s2 = inlined_call_operand.hbm [shape: f32[1,512], index: 2, kind: input, shape index: {}]   ;;  %s6587_s3 = inlined_call_operand.hbm [shape: bf16[512,512], index: 3, kind: input, shape index: {}]   ;;  %s6588_s4 = inlined_call_operand.hbm [shape: f32[1,512], index: 4, kind: input, shape index: {}]   ;;  %s6589_s5 = inlined_call_operand.hbm [shape: bf16[512,128], index: 5, kind: input, shape index: {}]   ;;  %s6590_s6 = inlined_call_operand.hbm [shape: f32[1,128], index: 6, kind: input, shape index: {}]   ;;  %s6591_s7 = inlined_call_operand.hbm [shape: f32[2,128], index: 7, kind: output, shape index: {}]  }
   0x1   :  { %13 = vsyncpa [#allocation6], 0 }
   0x2   :  { %14 = vsyncpa [#allocation9], 0 }
   0x3   :  { %15 = vsyncpa [#allocation12], 0 }
   0x4   :  { %16 = vsyncpa [#allocation4], 0  ;;  %s6315_s24 = smov [#allocation5]   ;;  %s6316_s26 = smov [#allocation8]  }
   0x5   :  { %s37_s25 = sshll.u32 %s6315_s24, 4  ;;  %s59_s27 = sshll.u32 %s6316_s26, 4  ;;  %s38_s25 = int_to_ptr.vmem [resolvable:$true] %s37_s25  ;;  %s60_s27 = int_to_ptr.vmem [resolvable:$true] %s59_s27 }
   0x6   :  { %s6151_s30 = scalar_lea.hbm %s6586_s2, 64 }
   0x7   :  { %p6152_p0 = scmp.ne.s32.totalorder %s6586_s2, %s6151_s30  ;;  %p6155_p1 = scmp.lt.u32.totalorder %s6151_s30, %s6586_s2 }
   0x9   :  { %p6157_p2 = pnand %p6155_p1, %p6152_p0 }
   0xb   :  { %6160 = shalt.err (!%p6157_p2)
}
   0xc   :  { %s6161_s12 = scalar_lea.vmem %s38_s25, 64  ;;  %p6166_p4 = scmp.lt.s32.totalorder %s38_s25, %s38_s25 }
   0xd   :  { %p6162_p3 = scmp.ne.s32.totalorder %s38_s25, %s6161_s12  ;;  %p6167_p5 = scmp.lt.s32.totalorder %s6161_s12, %s6161_s12 }
   0xf   :  { %p6168_p6 = por %p6167_p5, %p6166_p4 }
  0x11   :  { %p6169_p7 = pnand %p6168_p6, %p6162_p3 }
  0x13   :  { %6172 = shalt.err (!%p6169_p7)
}
  0x14   :  { %40 = dma.hbm_to_vmem [thread:$0]  %s6586_s2, 64, %s38_s25, [#allocation6]  }
  0x15   :  { %s6173_s17 = scalar_lea.hbm %s6588_s4, 64 }
  0x16   :  { %p6174_p8 = scmp.ne.s32.totalorder %s6588_s4, %s6173_s17  ;;  %p6177_p9 = scmp.lt.u32.totalorder %s6173_s17, %s6588_s4 }
  0x18   :  { %p6179_p10 = pnand %p6177_p9, %p6174_p8 }
  0x1a   :  { %6182 = shalt.err (!%p6179_p10)
}
  0x1b   :  { %s6183_s22 = scalar_lea.vmem %s60_s27, 64  ;;  %p6188_p12 = scmp.lt.s32.totalorder %s60_s27, %s60_s27 }
  0x1c   :  { %p6184_p11 = scmp.ne.s32.totalorder %s60_s27, %s6183_s22  ;;  %p6189_p13 = scmp.lt.s32.totalorder %s6183_s22, %s6183_s22 }
  0x1e   :  { %p6190_p0 = por %p6189_p13, %p6188_p12 }
  0x20   :  { %p6191_p1 = pnand %p6190_p0, %p6184_p11 }
  0x22   :  { %6194 = shalt.err (!%p6191_p1)
}
  0x23   :  { %62 = dma.hbm_to_vmem [thread:$0]  %s6588_s4, 64, %s60_s27, [#allocation9]  }
  0x24   :  { %s6317_s24 = smov [#allocation2]   ;;  %s6195_s29 = scalar_lea.hbm %s6585_s1, 51200 }
  0x25   :  { %s24_s25 = sshll.u32 %s6317_s24, 4  ;;  %p6196_p2 = scmp.ne.s32.totalorder %s6585_s1, %s6195_s29  ;;  %s25_s25 = int_to_ptr.vmem [resolvable:$true] %s24_s25 }
  0x26   :  { %p6199_p3 = scmp.lt.u32.totalorder %s6195_s29, %s6585_s1 }
  0x28   :  { %p6201_p4 = pnand %p6199_p3, %p6196_p2 }
  0x2a   :  { %6204 = shalt.err (!%p6201_p4)
}
  0x2b   :  { %s6205_s11 = scalar_lea.vmem %s25_s25, 51200  ;;  %p6210_p6 = scmp.lt.s32.totalorder %s25_s25, %s25_s25 }
  0x2c   :  { %p6206_p5 = scmp.ne.s32.totalorder %s25_s25, %s6205_s11  ;;  %p6211_p7 = scmp.lt.s32.totalorder %s6205_s11, %s6205_s11 }
  0x2e   :  { %p6212_p8 = por %p6211_p7, %p6210_p6 }
  0x30   :  { %p6213_p9 = pnand %p6212_p8, %p6206_p5 }
  0x32   :  { %6216 = shalt.err (!%p6213_p9)
}
  0x33   :  { %s6318_s4 = smov 256   ;;  %s6319_s27 = smov 16  }
  0x34   :  { %30 = dma.hbm_to_vmem [thread:$0]  %s6585_s1, 51200, %s25_s25, [#allocation3], %s6318_s4, %s6318_s4, %s6319_s27  }
  0x35   :  { %s6320_s14 = smov [#allocation7]   ;;  %s6321_s16 = smov [#allocation10]  }
  0x36   :  { %s46_s15 = sshll.u32 %s6320_s14, 4  ;;  %s68_s17 = sshll.u32 %s6321_s16, 4  ;;  %s47_s15 = int_to_ptr.vmem [resolvable:$true] %s46_s15  ;;  %s69_s17 = int_to_ptr.vmem [resolvable:$true] %s68_s17 }
  0x37   :  { %s6217_s20 = scalar_lea.hbm %s6587_s3, 16384 }
  0x38   :  { %p6218_p10 = scmp.ne.s32.totalorder %s6587_s3, %s6217_s20  ;;  %p6221_p11 = scmp.lt.u32.totalorder %s6217_s20, %s6587_s3 }
  0x3a   :  { %p6223_p12 = pnand %p6221_p11, %p6218_p10 }
  0x3c   :  { %6226 = shalt.err (!%p6223_p12)
}
  0x3d   :  { %s6227_s1 = scalar_lea.vmem %s47_s15, 16384  ;;  %p6232_p0 = scmp.lt.s32.totalorder %s47_s15, %s47_s15 }
  0x3e   :  { %p6228_p13 = scmp.ne.s32.totalorder %s47_s15, %s6227_s1  ;;  %p6233_p1 = scmp.lt.s32.totalorder %s6227_s1, %s6227_s1 }
  0x40   :  { %p6234_p2 = por %p6233_p1, %p6232_p0 }
  0x42   :  { %p6235_p3 = pnand %p6234_p2, %p6228_p13 }
  0x44   :  { %6238 = shalt.err (!%p6235_p3)
}
  0x45   :  { %52 = dma.hbm_to_vmem [thread:$0]  %s6587_s3, 16384, %s47_s15, [#allocation6], %s6318_s4, %s6318_s4, %s6319_s27  }
  0x46   :  { %s6239_s29 = scalar_lea.hbm %s6589_s5, 4096 }
  0x47   :  { %p6240_p4 = scmp.ne.s32.totalorder %s6589_s5, %s6239_s29  ;;  %p6243_p5 = scmp.lt.u32.totalorder %s6239_s29, %s6589_s5 }
  0x49   :  { %p6245_p6 = pnand %p6243_p5, %p6240_p4 }
  0x4b   :  { %6248 = shalt.err (!%p6245_p6)
}
  0x4c   :  { %s6249_s11 = scalar_lea.vmem %s69_s17, 4096  ;;  %p6254_p8 = scmp.lt.s32.totalorder %s69_s17, %s69_s17 }
  0x4d   :  { %p6250_p7 = scmp.ne.s32.totalorder %s69_s17, %s6249_s11  ;;  %p6255_p9 = scmp.lt.s32.totalorder %s6249_s11, %s6249_s11 }
  0x4f   :  { %p6256_p10 = por %p6255_p9, %p6254_p8 }
  0x51   :  { %p6257_p11 = pnand %p6256_p10, %p6250_p7 }
  0x53   :  { %6260 = shalt.err (!%p6257_p11)
}
  0x54   :  { %s6322_s3 = smov 64   ;;  %s6323_s4 = smov 4  }
  0x55   :  { %74 = dma.hbm_to_vmem [thread:$0]  %s6589_s5, 4096, %s69_s17, [#allocation9], %s6322_s3, %s6322_s3, %s6323_s4  }
  0x56   :  { %s6324_s13 = smov [#allocation11]   ;;  %s6261_s18 = scalar_lea.hbm %s6590_s6, 16 }
  0x57   :  { %s81_s14 = sshll.u32 %s6324_s13, 4  ;;  %p6262_p12 = scmp.ne.s32.totalorder %s6590_s6, %s6261_s18  ;;  %s82_s14 = int_to_ptr.vmem [resolvable:$true] %s81_s14 }
  0x58   :  { %p6265_p13 = scmp.lt.u32.totalorder %s6261_s18, %s6590_s6 }
  0x5a   :  { %p6267_p0 = pnand %p6265_p13, %p6262_p12 }
  0x5c   :  { %6270 = shalt.err (!%p6267_p0)
}
  0x5d   :  { %s6271_s2 = scalar_lea.vmem %s82_s14, 16  ;;  %s6275_s5 = scalar_lea.vmem %s82_s14, 32 }
  0x5e   :  { %p6272_p1 = scmp.ne.s32.totalorder %s82_s14, %s6271_s2  ;;  %p6276_p2 = scmp.lt.s32.totalorder %s82_s14, %s82_s14 }
  0x5f   :  { %p6277_p3 = scmp.lt.s32.totalorder %s6275_s5, %s6271_s2 }
  0x61   :  { %p6278_p4 = por %p6277_p3, %p6276_p2 }
  0x63   :  { %p6279_p5 = pnand %p6278_p4, %p6272_p1 }
  0x65   :  { %6282 = shalt.err (!%p6279_p5)
}
  0x66   :  { %84 = dma.hbm_to_vmem [thread:$0]  %s6590_s6, 16, %s82_s14, [#allocation12]  }
  0x67   :  { %6305 = dma.done.wait [#allocation3], 51200  }
  0x68   :  { %6306 = vsyncadd [#allocation3], 4294916096 }
  0x69   :  { %6307 = dma.done.wait [#allocation6], 16448  }
  0x6a   :  { %6308 = vsyncadd [#allocation6], 4294950848 }
  0x6b   :  { %6309 = dma.done.wait [#allocation9], 4160  }
  0x6c   :  { %6310 = vsyncadd [#allocation9], 4294963136 }
  0x6d   :  { %6311 = dma.done.wait [#allocation12], 16  }
  0x6e   :  { %6312 = vsyncadd [#allocation12], 4294967280  ;;  %v5307_v0 = vld [vmem:[#allocation2 + $0x4] ss:$16 sps:$4 sm:$0xff]   ;;  %v5309_v1 = vld [vmem:[#allocation2 + $0xc] ss:$16 sps:$4 sm:$0xff]   ;;  %v143_v40 = vlaneseq }
  0x6f   :  { %2713 = vmatprep.subr.bf16.mxu0 %v5307_v0  ;;  %v5311_v2 = vld [vmem:[#allocation2] ss:$16 sps:$4 sm:$0xff]   ;;  %v5312_v3 = vld [vmem:[#allocation2 + $0x8] ss:$16 sps:$4 sm:$0xff]   ;;  %3000 = vmatprep.subr.bf16.mxu1 %v5309_v1  ;;  %v5313_v4 = vld [vmem:[#allocation2 + $0x24] ss:$16 sps:$4 sm:$0xff]  }
  0x70   :  { %2714 = vmatpush1.bf16.msra.mxu0 %v5311_v2  ;;  %3001 = vmatpush1.bf16.msra.mxu1 %v5312_v3  ;;  %v5315_v5 = vld [vmem:[#allocation2 + $0x2c] ss:$16 sps:$4 sm:$0xff]   ;;  %v5317_v6 = vld [vmem:[#allocation2 + $0x20] ss:$16 sps:$4 sm:$0xff]   ;;  %v5318_v7 = vld [vmem:[#allocation2 + $0x28] ss:$16 sps:$4 sm:$0xff]  }
  0x71   :  { %2715 = vmatprep.subr.bf16.mxu0 %v5313_v4  ;;  %3002 = vmatprep.subr.bf16.mxu1 %v5315_v5  ;;  %v5319_v8 = vld [vmem:[#allocation2 + $0x44] ss:$16 sps:$4 sm:$0xff]   ;;  %v5321_v9 = vld [vmem:[#allocation2 + $0x4c] ss:$16 sps:$4 sm:$0xff]   ;;  %v5323_v10 = vld [vmem:[#allocation2 + $0x40] ss:$16 sps:$4 sm:$0xff]  }
  0x72   :  { %v5324_v11 = vld [vmem:[#allocation2 + $0x48] ss:$16 sps:$4 sm:$0xff]   ;;  %v5325_v12 = vld [vmem:[#allocation2 + $0x64] ss:$16 sps:$4 sm:$0xff]   ;;  %v5327_v13 = vld [vmem:[#allocation2 + $0x6c] ss:$16 sps:$4 sm:$0xff]  }
  0x73   :  { %v5329_v14 = vld [vmem:[#allocation2 + $0x60] ss:$16 sps:$4 sm:$0xff]   ;;  %v5330_v15 = vld [vmem:[#allocation2 + $0x68] ss:$16 sps:$4 sm:$0xff]   ;;  %v5331_v16 = vld [vmem:[#allocation2 + $0x84] ss:$16 sps:$4 sm:$0xff]  }
  0x74   :  { %2716 = vmatpush1.bf16.msra.mxu0 %v5317_v6  ;;  %3003 = vmatpush1.bf16.msra.mxu1 %v5318_v7  ;;  %v5333_v17 = vld [vmem:[#allocation2 + $0x8c] ss:$16 sps:$4 sm:$0xff]   ;;  %v5335_v18 = vld [vmem:[#allocation2 + $0x80] ss:$16 sps:$4 sm:$0xff]   ;;  %v5336_v19 = vld [vmem:[#allocation2 + $0x88] ss:$16 sps:$4 sm:$0xff]  }
  0x75   :  { %2717 = vmatprep.subr.bf16.mxu0 %v5319_v8  ;;  %3004 = vmatprep.subr.bf16.mxu1 %v5321_v9  ;;  %v5337_v20 = vld [vmem:[#allocation2 + $0xa4] ss:$16 sps:$4 sm:$0xff]   ;;  %v5339_v21 = vld [vmem:[#allocation2 + $0xac] ss:$16 sps:$4 sm:$0xff]   ;;  %v5341_v22 = vld [vmem:[#allocation2 + $0xa0] ss:$16 sps:$4 sm:$0xff]  }
  0x76   :  { %v5342_v23 = vld [vmem:[#allocation2 + $0xa8] ss:$16 sps:$4 sm:$0xff]   ;;  %v5343_v24 = vld [vmem:[#allocation2 + $0xc4] ss:$16 sps:$4 sm:$0xff]   ;;  %v5345_v25 = vld [vmem:[#allocation2 + $0xcc] ss:$16 sps:$4 sm:$0xff]  }
  0x77   :  { %v5347_v26 = vld [vmem:[#allocation2 + $0xc0] ss:$16 sps:$4 sm:$0xff]   ;;  %v5348_v27 = vld [vmem:[#allocation2 + $0xc8] ss:$16 sps:$4 sm:$0xff]   ;;  %v5349_v28 = vld [vmem:[#allocation2 + $0xe4] ss:$16 sps:$4 sm:$0xff]  }
  0x78   :  { %2718 = vmatpush1.bf16.msra.mxu0 %v5323_v10  ;;  %3005 = vmatpush1.bf16.msra.mxu1 %v5324_v11  ;;  %v5351_v29 = vld [vmem:[#allocation2 + $0xec] ss:$16 sps:$4 sm:$0xff]   ;;  %v5353_v30 = vld [vmem:[#allocation2 + $0xe0] ss:$16 sps:$4 sm:$0xff]   ;;  %v5354_v31 = vld [vmem:[#allocation2 + $0xe8] ss:$16 sps:$4 sm:$0xff]  }
  0x79   :  { %2719 = vmatprep.subr.bf16.mxu0 %v5325_v12  ;;  %3006 = vmatprep.subr.bf16.mxu1 %v5327_v13  ;;  %v5355_v32 = vld [vmem:[#allocation2 + $0x104] ss:$16 sps:$4 sm:$0xff]   ;;  %v5357_v33 = vld [vmem:[#allocation2 + $0x10c] ss:$16 sps:$4 sm:$0xff]   ;;  %v5359_v34 = vld [vmem:[#allocation2 + $0x100] ss:$16 sps:$4 sm:$0xff]  }
  0x7a   :  { %v5360_v35 = vld [vmem:[#allocation2 + $0x108] ss:$16 sps:$4 sm:$0xff]   ;;  %v5361_v36 = vld [vmem:[#allocation2 + $0x124] ss:$16 sps:$4 sm:$0xff]   ;;  %v5363_v37 = vld [vmem:[#allocation2 + $0x12c] ss:$16 sps:$4 sm:$0xff]  }
  0x7b   :  { %v6325_v38 = vmov 1983009808   ;;  %v5365_v41 = vld [vmem:[#allocation2 + $0x120] ss:$16 sps:$4 sm:$0xff]   ;;  %v5366_v42 = vld [vmem:[#allocation2 + $0x128] ss:$16 sps:$4 sm:$0xff]  }
  0x7c   :  { %2720 = vmatpush1.bf16.msra.mxu0 %v5329_v14  ;;  %3007 = vmatpush1.bf16.msra.mxu1 %v5330_v15  ;;  %v141_v39 = vunpack.c.l.s4 %v6325_v38  ;;  %v5367_v43 = vld [vmem:[#allocation2 + $0x144] ss:$16 sps:$4 sm:$0xff]   ;;  %v5369_v44 = vld [vmem:[#allocation2 + $0x14c] ss:$16 sps:$4 sm:$0xff]   ;;  %v6442_v46 = vshrl.u32 %v143_v40, 7  ;;  %vm2709_vm0 = vcmask 523264  }
  0x7d   :  { %2721 = vmatprep.subr.bf16.mxu0 %v5331_v16  ;;  %3008 = vmatprep.subr.bf16.mxu1 %v5333_v17  ;;  %v5371_v47 = vld [vmem:[#allocation2 + $0x140] ss:$16 sps:$4 sm:$0xff]   ;;  %v5372_v48 = vld [vmem:[#allocation2 + $0x148] ss:$16 sps:$4 sm:$0xff]   ;;  %v5373_v49 = vld [vmem:[#allocation2 + $0x164] ss:$16 sps:$4 sm:$0xff]  }
  0x7e   :  { %v142_v45 = vunpack.c.0.s8 %v141_v39  ;;  %v5375_v50 = vld [vmem:[#allocation2 + $0x16c] ss:$16 sps:$4 sm:$0xff]   ;;  %v5377_v51 = vld [vmem:[#allocation2 + $0x160] ss:$16 sps:$4 sm:$0xff]   ;;  %v5378_v52 = vld [vmem:[#allocation2 + $0x168] ss:$16 sps:$4 sm:$0xff]  }
  0x7f   :  { %v5379_v54 = vld [vmem:[#allocation2 + $0x184] ss:$16 sps:$4 sm:$0xff]   ;;  %v5403_v55 = vld [vmem:[%s6584_s0] ss:$26 sps:$4 sm:$0xff]  }
  0x80   :  { %2722 = vmatpush1.bf16.msra.mxu0 %v5335_v18  ;;  %3009 = vmatpush1.bf16.msra.mxu1 %v5336_v19  ;;  %v6445_v53 = vsub.s32 %v142_v45, %v6442_v46  ;;  %v5406_v56 = vld [vmem:[%s6584_s0 + $0x34] ss:$26 sps:$4 sm:$0xff]   ;;  %v5384_v61 = vld [vmem:[#allocation2 + $0x188] ss:$16 sps:$4 sm:$0xff]   ;;  %v5405_v6 = vld [vmem:[%s6584_s0 + $0x4] ss:$26 sps:$4 sm:$0xff]  }
  0x81   :  { %2723 = vmatprep.subr.bf16.mxu0 %v5337_v20  ;;  %3010 = vmatprep.subr.bf16.mxu1 %v5339_v21  ;;  %v5381_v57 = vld [vmem:[#allocation2 + $0x18c] ss:$16 sps:$4 sm:$0xff]   ;;  %v5383_v60 = vld [vmem:[#allocation2 + $0x180] ss:$16 sps:$4 sm:$0xff]   ;;  %v5385_v62 = vld [vmem:[#allocation2 + $0x1a4] ss:$16 sps:$4 sm:$0xff]  }
  0x82   :  { %v146_v58 = vrot.slane %v5403_v55, %v6445_v53  ;;  %v160_v59 = vrot.slane %v5406_v56, %v6445_v53  ;;  %v5387_v0 = vld [vmem:[#allocation2 + $0x1ac] ss:$16 sps:$4 sm:$0xff]   ;;  %v5389_v2 = vld [vmem:[#allocation2 + $0x1a0] ss:$16 sps:$4 sm:$0xff]   ;;  %v5390_v3 = vld [vmem:[#allocation2 + $0x1a8] ss:$16 sps:$4 sm:$0xff]   ;;  %v6462_v12 = vrot.slane %v5405_v6, %v6445_v53 }
  0x83   :  { %v5391_v4 = vld [vmem:[#allocation2 + $0x1c4] ss:$16 sps:$4 sm:$0xff]   ;;  %v5393_v5 = vld [vmem:[#allocation2 + $0x1cc] ss:$16 sps:$4 sm:$0xff]   ;;  %v5395_v8 = vld [vmem:[#allocation2 + $0x1c0] ss:$16 sps:$4 sm:$0xff]  }
  0x84   :  { %2724 = vmatpush1.bf16.msra.mxu0 %v5341_v22  ;;  %3011 = vmatpush1.bf16.msra.mxu1 %v5342_v23  ;;  %v169_v63 = vcombine.high %v146_v58, %v160_v59  ;;  %v5408_v7 = vld [vmem:[%s6584_s0 + $0x38] ss:$26 sps:$4 sm:$0xff]   ;;  %v5399_v11 = vld [vmem:[#allocation2 + $0x1ec] ss:$16 sps:$4 sm:$0xff]   ;;  %v168_v16 = vcombine.low %v146_v58, %v160_v59 }
  0x85   :  { %2725 = vmatprep.subr.bf16.mxu0 %v5343_v24  ;;  %3012 = vmatprep.subr.bf16.mxu1 %v5345_v25  ;;  %v5396_v9 = vld [vmem:[#allocation2 + $0x1c8] ss:$16 sps:$4 sm:$0xff]   ;;  %v5397_v10 = vld [vmem:[#allocation2 + $0x1e4] ss:$16 sps:$4 sm:$0xff]   ;;  %v6465_v13 = vrot.slane %v5408_v7, %v6445_v53  ;;  %v5401_v14 = vld [vmem:[#allocation2 + $0x1e0] ss:$16 sps:$4 sm:$0xff]  }
  0x86   :  { %v275_v1 = vpack.c.bf16 %v169_v63, %v169_v63  ;;  %v5402_v15 = vld [vmem:[#allocation2 + $0x1e8] ss:$16 sps:$4 sm:$0xff]   ;;  %v5411_v17 = vld [vmem:[#allocation2 + $0x204] ss:$16 sps:$4 sm:$0xff]   ;;  %v5414_v18 = vld [vmem:[#allocation2 + $0x20c] ss:$16 sps:$4 sm:$0xff]   ;;  %v274_v22 = vpack.c.bf16 %v168_v16, %v168_v16 }
  0x87   :  { %v171_v19 = vcombine.high %v6462_v12, %v6465_v13  ;;  %v5409_v20 = vld [vmem:[#allocation2 + $0x200] ss:$16 sps:$4 sm:$0xff]   ;;  %v5412_v21 = vld [vmem:[#allocation2 + $0x208] ss:$16 sps:$4 sm:$0xff]   ;;  %v5417_v23 = vld [vmem:[#allocation2 + $0x224] ss:$16 sps:$4 sm:$0xff]  }
  0x88   :  { %2726 = vmatpush1.bf16.msra.mxu0 %v5347_v26  ;;  %3013 = vmatpush1.bf16.msra.mxu1 %v5348_v27  ;;  %v5420_v24 = vld [vmem:[#allocation2 + $0x22c] ss:$16 sps:$4 sm:$0xff]   ;;  %v5415_v26 = vld [vmem:[#allocation2 + $0x220] ss:$16 sps:$4 sm:$0xff]   ;;  %v5418_v27 = vld [vmem:[#allocation2 + $0x228] ss:$16 sps:$4 sm:$0xff]  }
  0x89   :  { %2727 = vmatprep.subr.bf16.mxu0 %v5349_v28  ;;  %3014 = vmatprep.subr.bf16.mxu1 %v5351_v29  ;;  %v277_v25 = vpack.c.bf16 %v171_v19, %v171_v19  ;;  %v5423_v28 = vld [vmem:[#allocation2 + $0x244] ss:$16 sps:$4 sm:$0xff]   ;;  %v5426_v29 = vld [vmem:[#allocation2 + $0x24c] ss:$16 sps:$4 sm:$0xff]   ;;  %v5433_v38 = vld [vmem:[#allocation2 + $0x280] ss:$16 sps:$4 sm:$0xff]  }
  0x8a   :  { %2745 = vmatprep.mubr.bf16.mxu0 %v275_v1  ;;  %3032 = vmatprep.mubr.bf16.mxu1 %v275_v1  ;;  %v5436_v39 = vld [vmem:[#allocation2 + $0x288] ss:$16 sps:$4 sm:$0xff]   ;;  %v5441_v40 = vld [vmem:[#allocation2 + $0x2a4] ss:$16 sps:$4 sm:$0xff]   ;;  %v5450_v45 = vld [vmem:[#allocation2 + $0x2cc] ss:$16 sps:$4 sm:$0xff]  }
  0x8b   :  { %v5462_v55 = vld [vmem:[#allocation2 + $0x30c] ss:$16 sps:$4 sm:$0xff]   ;;  %v5457_v56 = vld [vmem:[#allocation2 + $0x300] ss:$16 sps:$4 sm:$0xff]   ;;  %v5465_v58 = vld [vmem:[#allocation2 + $0x324] ss:$16 sps:$4 sm:$0xff]  }
  0x8c   :  { %2728 = vmatpush1.bf16.msra.mxu0 %v5353_v30  ;;  %3015 = vmatpush1.bf16.msra.mxu1 %v5354_v31  ;;  %v5421_v30 = vld [vmem:[#allocation2 + $0x240] ss:$16 sps:$4 sm:$0xff]   ;;  %v5424_v31 = vld [vmem:[#allocation2 + $0x248] ss:$16 sps:$4 sm:$0xff]   ;;  %v5468_v59 = vld [vmem:[#allocation2 + $0x32c] ss:$16 sps:$4 sm:$0xff]  }
  0x8d   :  { %2729 = vmatprep.subr.bf16.mxu0 %v5355_v32  ;;  %3016 = vmatprep.subr.bf16.mxu1 %v5357_v33  ;;  %v5429_v32 = vld [vmem:[#allocation2 + $0x264] ss:$16 sps:$4 sm:$0xff]   ;;  %v5432_v33 = vld [vmem:[#allocation2 + $0x26c] ss:$16 sps:$4 sm:$0xff]   ;;  %v5472_v1 = vld [vmem:[#allocation2 + $0x348] ss:$16 sps:$4 sm:$0xff]  }
  0x8e   :  { %v5474_v63 = vld [vmem:[#allocation2 + $0x34c] ss:$16 sps:$4 sm:$0xff]   ;;  %v5483_v6 = vld [vmem:[#allocation2 + $0x384] ss:$16 sps:$4 sm:$0xff]   ;;  %v5496_v19 = vld [vmem:[#allocation2 + $0x3c8] ss:$16 sps:$4 sm:$0xff]  }
  0x8f   :  { %v5486_v7 = vld [vmem:[#allocation2 + $0x38c] ss:$16 sps:$4 sm:$0xff]   ;;  %v5495_v16 = vld [vmem:[#allocation2 + $0x3c4] ss:$16 sps:$4 sm:$0xff]  }
  0x90   :  { %2730 = vmatpush1.bf16.msra.mxu0 %v5359_v34  ;;  %3017 = vmatpush1.bf16.msra.mxu1 %v5360_v35  ;;  %v5427_v34 = vld [vmem:[#allocation2 + $0x260] ss:$16 sps:$4 sm:$0xff]   ;;  %v5430_v35 = vld [vmem:[#allocation2 + $0x268] ss:$16 sps:$4 sm:$0xff]  }
  0x91   :  { %2731 = vmatprep.subr.bf16.mxu0 %v5361_v36  ;;  %3018 = vmatprep.subr.bf16.mxu1 %v5363_v37  ;;  %v5435_v36 = vld [vmem:[#allocation2 + $0x284] ss:$16 sps:$4 sm:$0xff]   ;;  %v5438_v37 = vld [vmem:[#allocation2 + $0x28c] ss:$16 sps:$4 sm:$0xff]  }
  0x94   :  { %2732 = vmatpush1.bf16.msra.mxu0 %v5365_v41  ;;  %3019 = vmatpush1.bf16.msra.mxu1 %v5366_v42  ;;  %v5444_v41 = vld [vmem:[#allocation2 + $0x2ac] ss:$16 sps:$4 sm:$0xff]   ;;  %v5439_v42 = vld [vmem:[#allocation2 + $0x2a0] ss:$16 sps:$4 sm:$0xff]  }
  0x95   :  { %2733 = vmatprep.subr.bf16.mxu0 %v5367_v43  ;;  %3020 = vmatprep.subr.bf16.mxu1 %v5369_v44  ;;  %v5442_v43 = vld [vmem:[#allocation2 + $0x2a8] ss:$16 sps:$4 sm:$0xff]   ;;  %v5447_v44 = vld [vmem:[#allocation2 + $0x2c4] ss:$16 sps:$4 sm:$0xff]  }
  0x98   :  { %2734 = vmatpush1.bf16.msra.mxu0 %v5371_v47  ;;  %3021 = vmatpush1.bf16.msra.mxu1 %v5372_v48  ;;  %v5445_v47 = vld [vmem:[#allocation2 + $0x2c0] ss:$16 sps:$4 sm:$0xff]   ;;  %v5448_v48 = vld [vmem:[#allocation2 + $0x2c8] ss:$16 sps:$4 sm:$0xff]  }
  0x99   :  { %2735 = vmatprep.subr.bf16.mxu0 %v5373_v49  ;;  %3022 = vmatprep.subr.bf16.mxu1 %v5375_v50  ;;  %v5453_v49 = vld [vmem:[#allocation2 + $0x2e4] ss:$16 sps:$4 sm:$0xff]   ;;  %v5456_v50 = vld [vmem:[#allocation2 + $0x2ec] ss:$16 sps:$4 sm:$0xff]  }
  0x9c   :  { %2736 = vmatpush1.bf16.msra.mxu0 %v5377_v51  ;;  %3023 = vmatpush1.bf16.msra.mxu1 %v5378_v52  ;;  %v5451_v51 = vld [vmem:[#allocation2 + $0x2e0] ss:$16 sps:$4 sm:$0xff]   ;;  %v5454_v52 = vld [vmem:[#allocation2 + $0x2e8] ss:$16 sps:$4 sm:$0xff]  }
  0x9d   :  { %2737 = vmatprep.subr.bf16.mxu0 %v5379_v54  ;;  %3024 = vmatprep.subr.bf16.mxu1 %v5381_v57  ;;  %v5459_v54 = vld [vmem:[#allocation2 + $0x304] ss:$16 sps:$4 sm:$0xff]   ;;  %v5460_v57 = vld [vmem:[#allocation2 + $0x308] ss:$16 sps:$4 sm:$0xff]  }
  0xa0   :  { %2738 = vmatpush1.bf16.msra.mxu0 %v5383_v60  ;;  %3025 = vmatpush1.bf16.msra.mxu1 %v5384_v61  ;;  %v5463_v60 = vld [vmem:[#allocation2 + $0x320] ss:$16 sps:$4 sm:$0xff]   ;;  %v5466_v61 = vld [vmem:[#allocation2 + $0x328] ss:$16 sps:$4 sm:$0xff]  }
  0xa1   :  { %2739 = vmatprep.subr.bf16.mxu0 %v5385_v62  ;;  %3026 = vmatprep.subr.bf16.mxu1 %v5387_v0  ;;  %v5471_v62 = vld [vmem:[#allocation2 + $0x344] ss:$16 sps:$4 sm:$0xff]   ;;  %v5469_v0 = vld [vmem:[#allocation2 + $0x340] ss:$16 sps:$4 sm:$0xff]  }
  0xa4   :  { %2740 = vmatpush1.bf16.msra.mxu0 %v5389_v2  ;;  %3027 = vmatpush1.bf16.msra.mxu1 %v5390_v3  ;;  %v5477_v2 = vld [vmem:[#allocation2 + $0x364] ss:$16 sps:$4 sm:$0xff]   ;;  %v5480_v3 = vld [vmem:[#allocation2 + $0x36c] ss:$16 sps:$4 sm:$0xff]  }
  0xa5   :  { %2741 = vmatprep.subr.bf16.mxu0 %v5391_v4  ;;  %3028 = vmatprep.subr.bf16.mxu1 %v5393_v5  ;;  %v5475_v4 = vld [vmem:[#allocation2 + $0x360] ss:$16 sps:$4 sm:$0xff]   ;;  %v5478_v5 = vld [vmem:[#allocation2 + $0x368] ss:$16 sps:$4 sm:$0xff]  }
  0xa8   :  { %2742 = vmatpush1.bf16.msra.mxu0 %v5395_v8  ;;  %3029 = vmatpush1.bf16.msra.mxu1 %v5396_v9  ;;  %v5481_v8 = vld [vmem:[#allocation2 + $0x380] ss:$16 sps:$4 sm:$0xff]   ;;  %v5484_v9 = vld [vmem:[#allocation2 + $0x388] ss:$16 sps:$4 sm:$0xff]  }
  0xa9   :  { %2743 = vmatprep.subr.bf16.mxu0 %v5397_v10  ;;  %3030 = vmatprep.subr.bf16.mxu1 %v5399_v11  ;;  %v5489_v10 = vld [vmem:[#allocation2 + $0x3a4] ss:$16 sps:$4 sm:$0xff]   ;;  %v5492_v11 = vld [vmem:[#allocation2 + $0x3ac] ss:$16 sps:$4 sm:$0xff]  }
  0xac   :  { %2744 = vmatpush1.bf16.msra.mxu0 %v5401_v14  ;;  %3031 = vmatpush1.bf16.msra.mxu1 %v5402_v15  ;;  %v5487_v14 = vld [vmem:[#allocation2 + $0x3a0] ss:$16 sps:$4 sm:$0xff]   ;;  %v5490_v15 = vld [vmem:[#allocation2 + $0x3a8] ss:$16 sps:$4 sm:$0xff]  }
  0xad   :  { %2754 = vmatprep.subr.bf16.mxu0 %v5411_v17  ;;  %3041 = vmatprep.subr.bf16.mxu1 %v5414_v18  ;;  %v5498_v17 = vld [vmem:[#allocation2 + $0x3cc] ss:$16 sps:$4 sm:$0xff]   ;;  %v5493_v18 = vld [vmem:[#allocation2 + $0x3c0] ss:$16 sps:$4 sm:$0xff]  }
  0xaf   :  { %2746 = vmatmul.mubr.bf16.vlgmr.msra.gmra.mrb[0].mxu0 %v274_v22  ;;  %3033 = vmatmul.mubr.bf16.vlgmr.msra.gmra.mrb[0].mxu1 %v274_v22  ;;  %v5499_v22 = vld [vmem:[#allocation2 + $0x3e0] ss:$16 sps:$4 sm:$0xff]  }
  0xb0   :  { %2755 = vmatpush1.bf16.msra.mxu0 %v5409_v20  ;;  %3042 = vmatpush1.bf16.msra.mxu1 %v5412_v21  ;;  %v5501_v20 = vld [vmem:[#allocation2 + $0x3e4] ss:$16 sps:$4 sm:$0xff]   ;;  %v5504_v21 = vld [vmem:[#allocation2 + $0x3ec] ss:$16 sps:$4 sm:$0xff]  }
  0xb1   :  { %2756 = vmatprep.subr.bf16.mxu0 %v5417_v23  ;;  %3043 = vmatprep.subr.bf16.mxu1 %v5420_v24  ;;  %v5502_v23 = vld [vmem:[#allocation2 + $0x3e8] ss:$16 sps:$4 sm:$0xff]   ;;  %v170_v24 = vcombine.low %v6462_v12, %v6465_v13 }
  0xb2   :  { %2786 = vmatprep.mubr.bf16.mxu0 %v277_v25  ;;  %3073 = vmatprep.mubr.bf16.mxu1 %v277_v25  ;;  %v5507_v25 = vld [vmem:[#allocation2 + $0x404] ss:$16 sps:$4 sm:$0xff]  }
  0xb3   :  { %v5601_v12 = vld [vmem:[%s6584_s0 + $0x8] ss:$26 sps:$4 sm:$0xff]   ;;  %v5603_v13 = vld [vmem:[%s6584_s0 + $0x3c] ss:$26 sps:$4 sm:$0xff]  }
  0xb4   :  { %2757 = vmatpush1.bf16.msra.mxu0 %v5415_v26  ;;  %3044 = vmatpush1.bf16.msra.mxu1 %v5418_v27  ;;  %v5510_v26 = vld [vmem:[#allocation2 + $0x40c] ss:$16 sps:$4 sm:$0xff]   ;;  %v5505_v27 = vld [vmem:[#allocation2 + $0x400] ss:$16 sps:$4 sm:$0xff]  }
  0xb5   :  { %2758 = vmatprep.subr.bf16.mxu0 %v5423_v28  ;;  %3045 = vmatprep.subr.bf16.mxu1 %v5426_v29  ;;  %v5508_v28 = vld [vmem:[#allocation2 + $0x408] ss:$16 sps:$4 sm:$0xff]   ;;  %v276_v29 = vpack.c.bf16 %v170_v24, %v170_v24  ;;  %v5583_v24 = vld [vmem:[#allocation2 + $0x5a0] ss:$16 sps:$4 sm:$0xff]  }
  0xb8   :  { %2759 = vmatpush1.bf16.msra.mxu0 %v5421_v30  ;;  %3046 = vmatpush1.bf16.msra.mxu1 %v5424_v31  ;;  %v5513_v30 = vld [vmem:[#allocation2 + $0x424] ss:$16 sps:$4 sm:$0xff]   ;;  %v5516_v31 = vld [vmem:[#allocation2 + $0x42c] ss:$16 sps:$4 sm:$0xff]  }
  0xb9   :  { %2760 = vmatprep.subr.bf16.mxu0 %v5429_v32  ;;  %3047 = vmatprep.subr.bf16.mxu1 %v5432_v33  ;;  %v5511_v32 = vld [vmem:[#allocation2 + $0x420] ss:$16 sps:$4 sm:$0xff]   ;;  %v5514_v33 = vld [vmem:[#allocation2 + $0x428] ss:$16 sps:$4 sm:$0xff]  }
  0xbc   :  { %2761 = vmatpush1.bf16.msra.mxu0 %v5427_v34  ;;  %3048 = vmatpush1.bf16.msra.mxu1 %v5430_v35  ;;  %v5519_v34 = vld [vmem:[#allocation2 + $0x444] ss:$16 sps:$4 sm:$0xff]   ;;  %v5522_v35 = vld [vmem:[#allocation2 + $0x44c] ss:$16 sps:$4 sm:$0xff]  }
  0xbd   :  { %2762 = vmatprep.subr.bf16.mxu0 %v5435_v36  ;;  %3049 = vmatprep.subr.bf16.mxu1 %v5438_v37  ;;  %v6478_v36 = vrot.slane %v5601_v12, %v6445_v53  ;;  %v6481_v37 = vrot.slane %v5603_v13, %v6445_v53 }
  0xc0   :  { %2763 = vmatpush1.bf16.msra.mxu0 %v5433_v38  ;;  %3050 = vmatpush1.bf16.msra.mxu1 %v5436_v39  ;;  %v5517_v38 = vld [vmem:[#allocation2 + $0x440] ss:$16 sps:$4 sm:$0xff]   ;;  %v5520_v39 = vld [vmem:[#allocation2 + $0x448] ss:$16 sps:$4 sm:$0xff]  }
  0xc1   :  { %2764 = vmatprep.subr.bf16.mxu0 %v5441_v40  ;;  %3051 = vmatprep.subr.bf16.mxu1 %v5444_v41  ;;  %v205_v40 = vcombine.high %v6478_v36, %v6481_v37  ;;  %v5525_v41 = vld [vmem:[#allocation2 + $0x464] ss:$16 sps:$4 sm:$0xff]  }
  0xc4   :  { %2765 = vmatpush1.bf16.msra.mxu0 %v5439_v42  ;;  %3052 = vmatpush1.bf16.msra.mxu1 %v5442_v43  ;;  %v5528_v42 = vld [vmem:[#allocation2 + $0x46c] ss:$16 sps:$4 sm:$0xff]   ;;  %v279_v43 = vpack.c.bf16 %v205_v40, %v205_v40 }
  0xc5   :  { %2766 = vmatprep.subr.bf16.mxu0 %v5447_v44  ;;  %3053 = vmatprep.subr.bf16.mxu1 %v5450_v45  ;;  %v5523_v44 = vld [vmem:[#allocation2 + $0x460] ss:$16 sps:$4 sm:$0xff]   ;;  %v5526_v45 = vld [vmem:[#allocation2 + $0x468] ss:$16 sps:$4 sm:$0xff]   ;;  %v5610_v40 = vld [vmem:[#allocation2 + $0x60c] ss:$16 sps:$4 sm:$0xff]  }
  0xc8   :  { %2767 = vmatpush1.bf16.msra.mxu0 %v5445_v47  ;;  %3054 = vmatpush1.bf16.msra.mxu1 %v5448_v48  ;;  %v5531_v47 = vld [vmem:[#allocation2 + $0x484] ss:$16 sps:$4 sm:$0xff]   ;;  %v5534_v48 = vld [vmem:[#allocation2 + $0x48c] ss:$16 sps:$4 sm:$0xff]  }
  0xc9   :  { %2768 = vmatprep.subr.bf16.mxu0 %v5453_v49  ;;  %3055 = vmatprep.subr.bf16.mxu1 %v5456_v50  ;;  %v5529_v49 = vld [vmem:[#allocation2 + $0x480] ss:$16 sps:$4 sm:$0xff]   ;;  %v5532_v50 = vld [vmem:[#allocation2 + $0x488] ss:$16 sps:$4 sm:$0xff]  }
  0xcc   :  { %2769 = vmatpush1.bf16.msra.mxu0 %v5451_v51  ;;  %3056 = vmatpush1.bf16.msra.mxu1 %v5454_v52  ;;  %v5537_v51 = vld [vmem:[#allocation2 + $0x4a4] ss:$16 sps:$4 sm:$0xff]   ;;  %v5540_v52 = vld [vmem:[#allocation2 + $0x4ac] ss:$16 sps:$4 sm:$0xff]  }
  0xcd   :  { %2770 = vmatprep.subr.bf16.mxu0 %v5459_v54  ;;  %3057 = vmatprep.subr.bf16.mxu1 %v5462_v55  ;;  %v5535_v54 = vld [vmem:[#allocation2 + $0x4a0] ss:$16 sps:$4 sm:$0xff]   ;;  %v5538_v55 = vld [vmem:[#allocation2 + $0x4a8] ss:$16 sps:$4 sm:$0xff]  }
  0xd0   :  { %2771 = vmatpush1.bf16.msra.mxu0 %v5457_v56  ;;  %3058 = vmatpush1.bf16.msra.mxu1 %v5460_v57  ;;  %v5543_v56 = vld [vmem:[#allocation2 + $0x4c4] ss:$16 sps:$4 sm:$0xff]   ;;  %v5546_v57 = vld [vmem:[#allocation2 + $0x4cc] ss:$16 sps:$4 sm:$0xff]  }
  0xd1   :  { %2772 = vmatprep.subr.bf16.mxu0 %v5465_v58  ;;  %3059 = vmatprep.subr.bf16.mxu1 %v5468_v59  ;;  %v5541_v58 = vld [vmem:[#allocation2 + $0x4c0] ss:$16 sps:$4 sm:$0xff]   ;;  %v5544_v59 = vld [vmem:[#allocation2 + $0x4c8] ss:$16 sps:$4 sm:$0xff]  }
  0xd4   :  { %2773 = vmatpush1.bf16.msra.mxu0 %v5463_v60  ;;  %3060 = vmatpush1.bf16.msra.mxu1 %v5466_v61  ;;  %v5549_v60 = vld [vmem:[#allocation2 + $0x4e4] ss:$16 sps:$4 sm:$0xff]   ;;  %v5552_v61 = vld [vmem:[#allocation2 + $0x4ec] ss:$16 sps:$4 sm:$0xff]  }
  0xd5   :  { %2774 = vmatprep.subr.bf16.mxu0 %v5471_v62  ;;  %3061 = vmatprep.subr.bf16.mxu1 %v5474_v63  ;;  %v5547_v62 = vld [vmem:[#allocation2 + $0x4e0] ss:$16 sps:$4 sm:$0xff]   ;;  %v5550_v63 = vld [vmem:[#allocation2 + $0x4e8] ss:$16 sps:$4 sm:$0xff]  }
  0xd8   :  { %2775 = vmatpush1.bf16.msra.mxu0 %v5469_v0  ;;  %3062 = vmatpush1.bf16.msra.mxu1 %v5472_v1  ;;  %v5555_v0 = vld [vmem:[#allocation2 + $0x504] ss:$16 sps:$4 sm:$0xff]   ;;  %v5558_v1 = vld [vmem:[#allocation2 + $0x50c] ss:$16 sps:$4 sm:$0xff]  }
  0xd9   :  { %2776 = vmatprep.subr.bf16.mxu0 %v5477_v2  ;;  %3063 = vmatprep.subr.bf16.mxu1 %v5480_v3  ;;  %v5553_v2 = vld [vmem:[#allocation2 + $0x500] ss:$16 sps:$4 sm:$0xff]   ;;  %v5556_v3 = vld [vmem:[#allocation2 + $0x508] ss:$16 sps:$4 sm:$0xff]  }
  0xdc   :  { %2777 = vmatpush1.bf16.msra.mxu0 %v5475_v4  ;;  %3064 = vmatpush1.bf16.msra.mxu1 %v5478_v5  ;;  %v5561_v4 = vld [vmem:[#allocation2 + $0x524] ss:$16 sps:$4 sm:$0xff]   ;;  %v5564_v5 = vld [vmem:[#allocation2 + $0x52c] ss:$16 sps:$4 sm:$0xff]  }
  0xdd   :  { %2778 = vmatprep.subr.bf16.mxu0 %v5483_v6  ;;  %3065 = vmatprep.subr.bf16.mxu1 %v5486_v7  ;;  %v5559_v6 = vld [vmem:[#allocation2 + $0x520] ss:$16 sps:$4 sm:$0xff]   ;;  %v5562_v7 = vld [vmem:[#allocation2 + $0x528] ss:$16 sps:$4 sm:$0xff]  }
  0xe0   :  { %2779 = vmatpush1.bf16.msra.mxu0 %v5481_v8  ;;  %3066 = vmatpush1.bf16.msra.mxu1 %v5484_v9  ;;  %v5567_v8 = vld [vmem:[#allocation2 + $0x544] ss:$16 sps:$4 sm:$0xff]   ;;  %v5570_v9 = vld [vmem:[#allocation2 + $0x54c] ss:$16 sps:$4 sm:$0xff]  }
  0xe1   :  { %2780 = vmatprep.subr.bf16.mxu0 %v5489_v10  ;;  %3067 = vmatprep.subr.bf16.mxu1 %v5492_v11  ;;  %v5565_v10 = vld [vmem:[#allocation2 + $0x540] ss:$16 sps:$4 sm:$0xff]   ;;  %v5568_v11 = vld [vmem:[#allocation2 + $0x548] ss:$16 sps:$4 sm:$0xff]  }
  0xe4   :  { %2781 = vmatpush1.bf16.msra.mxu0 %v5487_v14  ;;  %3068 = vmatpush1.bf16.msra.mxu1 %v5490_v15  ;;  %v5573_v14 = vld [vmem:[#allocation2 + $0x564] ss:$16 sps:$4 sm:$0xff]   ;;  %v5576_v15 = vld [vmem:[#allocation2 + $0x56c] ss:$16 sps:$4 sm:$0xff]  }
  0xe5   :  { %2782 = vmatprep.subr.bf16.mxu0 %v5495_v16  ;;  %3069 = vmatprep.subr.bf16.mxu1 %v5498_v17  ;;  %v5571_v16 = vld [vmem:[#allocation2 + $0x560] ss:$16 sps:$4 sm:$0xff]   ;;  %v5574_v17 = vld [vmem:[#allocation2 + $0x568] ss:$16 sps:$4 sm:$0xff]  }
  0xe8   :  { %2783 = vmatpush1.bf16.msra.mxu0 %v5493_v18  ;;  %3070 = vmatpush1.bf16.msra.mxu1 %v5496_v19  ;;  %v5579_v18 = vld [vmem:[#allocation2 + $0x584] ss:$16 sps:$4 sm:$0xff]   ;;  %v5582_v19 = vld [vmem:[#allocation2 + $0x58c] ss:$16 sps:$4 sm:$0xff]  }
  0xe9   :  { %2784 = vmatprep.subr.bf16.mxu0 %v5501_v20  ;;  %3071 = vmatprep.subr.bf16.mxu1 %v5504_v21  ;;  %v5577_v20 = vld [vmem:[#allocation2 + $0x580] ss:$16 sps:$4 sm:$0xff]   ;;  %v5580_v21 = vld [vmem:[#allocation2 + $0x588] ss:$16 sps:$4 sm:$0xff]  }
  0xec   :  { %2785 = vmatpush1.bf16.msra.mxu0 %v5499_v22  ;;  %3072 = vmatpush1.bf16.msra.mxu1 %v5502_v23  ;;  %v5585_v22 = vld [vmem:[#allocation2 + $0x5a4] ss:$16 sps:$4 sm:$0xff]   ;;  %v5588_v23 = vld [vmem:[#allocation2 + $0x5ac] ss:$16 sps:$4 sm:$0xff]  }
  0xed   :  { %2795 = vmatprep.subr.bf16.mxu0 %v5507_v25  ;;  %3082 = vmatprep.subr.bf16.mxu1 %v5510_v26  ;;  %v5586_v25 = vld [vmem:[#allocation2 + $0x5a8] ss:$16 sps:$4 sm:$0xff]   ;;  %v5591_v26 = vld [vmem:[#allocation2 + $0x5c4] ss:$16 sps:$4 sm:$0xff]  }
  0xef   :  { %2787 = vmatmul.mubr.bf16.vlgmr.msra.gmra.mrb[0].mxu0 %v276_v29  ;;  %3074 = vmatmul.mubr.bf16.vlgmr.msra.gmra.mrb[0].mxu1 %v276_v29  ;;  %v5702_v29 = vld [vmem:[%s6584_s0 + $0x40] ss:$26 sps:$4 sm:$0xff]  }
  0xf0   :  { %2796 = vmatpush1.bf16.msra.mxu0 %v5505_v27  ;;  %3083 = vmatpush1.bf16.msra.mxu1 %v5508_v28  ;;  %v5594_v27 = vld [vmem:[#allocation2 + $0x5cc] ss:$16 sps:$4 sm:$0xff]   ;;  %v6495_v13 = vrot.slane %v5702_v29, %v6445_v53 }
  0xf1   :  { %2797 = vmatprep.subr.bf16.mxu0 %v5513_v30  ;;  %3084 = vmatprep.subr.bf16.mxu1 %v5516_v31  ;;  %v5701_v28 = vld [vmem:[%s6584_s0 + $0xc] ss:$26 sps:$4 sm:$0xff]   ;;  %v5589_v30 = vld [vmem:[#allocation2 + $0x5c0] ss:$16 sps:$4 sm:$0xff]  }
  0xf2   :  { %2827 = vmatprep.mubr.bf16.mxu0 %v279_v43  ;;  %3114 = vmatprep.mubr.bf16.mxu1 %v279_v43  ;;  %v5592_v31 = vld [vmem:[#allocation2 + $0x5c8] ss:$16 sps:$4 sm:$0xff]   ;;  %v6492_v12 = vrot.slane %v5701_v28, %v6445_v53  ;;  %v5679_v28 = vld [vmem:[#allocation2 + $0x784] ss:$16 sps:$4 sm:$0xff]   ;;  %v5682_v29 = vld [vmem:[#allocation2 + $0x78c] ss:$16 sps:$4 sm:$0xff]  }
  0xf3   :  { %v5608_v43 = vld [vmem:[#allocation2 + $0x608] ss:$16 sps:$4 sm:$0xff]  }
  0xf4   :  { %2798 = vmatpush1.bf16.msra.mxu0 %v5511_v32  ;;  %3085 = vmatpush1.bf16.msra.mxu1 %v5514_v33  ;;  %v5597_v32 = vld [vmem:[#allocation2 + $0x5e4] ss:$16 sps:$4 sm:$0xff]   ;;  %v5600_v33 = vld [vmem:[#allocation2 + $0x5ec] ss:$16 sps:$4 sm:$0xff]  }
  0xf5   :  { %2799 = vmatprep.subr.bf16.mxu0 %v5519_v34  ;;  %3086 = vmatprep.subr.bf16.mxu1 %v5522_v35  ;;  %v5595_v34 = vld [vmem:[#allocation2 + $0x5e0] ss:$16 sps:$4 sm:$0xff]   ;;  %v5598_v35 = vld [vmem:[#allocation2 + $0x5e8] ss:$16 sps:$4 sm:$0xff]  }
  0xf8   :  { %2800 = vmatpush1.bf16.msra.mxu0 %v5517_v38  ;;  %3087 = vmatpush1.bf16.msra.mxu1 %v5520_v39  ;;  %v204_v38 = vcombine.low %v6478_v36, %v6481_v37  ;;  %v5607_v39 = vld [vmem:[#allocation2 + $0x604] ss:$16 sps:$4 sm:$0xff]   ;;  %v5611_v36 = vld [vmem:[#allocation2 + $0x620] ss:$16 sps:$4 sm:$0xff]   ;;  %v5614_v37 = vld [vmem:[#allocation2 + $0x628] ss:$16 sps:$4 sm:$0xff]  }
  0xf9   :  { %2801 = vmatprep.subr.bf16.mxu0 %v5525_v41  ;;  %3088 = vmatprep.subr.bf16.mxu1 %v5528_v42  ;;  %v207_v41 = vcombine.high %v6492_v12, %v6495_v13  ;;  %v5605_v42 = vld [vmem:[#allocation2 + $0x600] ss:$16 sps:$4 sm:$0xff]  }
  0xfc   :  { %2802 = vmatpush1.bf16.msra.mxu0 %v5523_v44  ;;  %3089 = vmatpush1.bf16.msra.mxu1 %v5526_v45  ;;  %v278_v44 = vpack.c.bf16 %v204_v38, %v204_v38  ;;  %v5613_v45 = vld [vmem:[#allocation2 + $0x624] ss:$16 sps:$4 sm:$0xff]  }
  0xfd   :  { %2803 = vmatprep.subr.bf16.mxu0 %v5531_v47  ;;  %3090 = vmatprep.subr.bf16.mxu1 %v5534_v48  ;;  %v5616_v47 = vld [vmem:[#allocation2 + $0x62c] ss:$16 sps:$4 sm:$0xff]   ;;  %v281_v48 = vpack.c.bf16 %v207_v41, %v207_v41  ;;  %v5691_v38 = vld [vmem:[#allocation2 + $0x7c4] ss:$16 sps:$4 sm:$0xff]  }
  0xfe   :  { %v5801_v41 = vld [vmem:[%s6584_s0 + $0x44] ss:$26 sps:$4 sm:$0xff]  }
 0x100   :  { %2804 = vmatpush1.bf16.msra.mxu0 %v5529_v49  ;;  %3091 = vmatpush1.bf16.msra.mxu1 %v5532_v50  ;;  %v5619_v49 = vld [vmem:[#allocation2 + $0x644] ss:$16 sps:$4 sm:$0xff]   ;;  %v5622_v50 = vld [vmem:[#allocation2 + $0x64c] ss:$16 sps:$4 sm:$0xff]  }
 0x101   :  { %2805 = vmatprep.subr.bf16.mxu0 %v5537_v51  ;;  %3092 = vmatprep.subr.bf16.mxu1 %v5540_v52  ;;  %v5617_v51 = vld [vmem:[#allocation2 + $0x640] ss:$16 sps:$4 sm:$0xff]   ;;  %v5620_v52 = vld [vmem:[#allocation2 + $0x648] ss:$16 sps:$4 sm:$0xff]  }
 0x104   :  { %2806 = vmatpush1.bf16.msra.mxu0 %v5535_v54  ;;  %3093 = vmatpush1.bf16.msra.mxu1 %v5538_v55  ;;  %v5625_v54 = vld [vmem:[#allocation2 + $0x664] ss:$16 sps:$4 sm:$0xff]   ;;  %v5628_v55 = vld [vmem:[#allocation2 + $0x66c] ss:$16 sps:$4 sm:$0xff]  }
 0x105   :  { %2807 = vmatprep.subr.bf16.mxu0 %v5543_v56  ;;  %3094 = vmatprep.subr.bf16.mxu1 %v5546_v57  ;;  %v5623_v56 = vld [vmem:[#allocation2 + $0x660] ss:$16 sps:$4 sm:$0xff]   ;;  %v5626_v57 = vld [vmem:[#allocation2 + $0x668] ss:$16 sps:$4 sm:$0xff]  }
 0x108   :  { %2808 = vmatpush1.bf16.msra.mxu0 %v5541_v58  ;;  %3095 = vmatpush1.bf16.msra.mxu1 %v5544_v59  ;;  %v5631_v58 = vld [vmem:[#allocation2 + $0x684] ss:$16 sps:$4 sm:$0xff]   ;;  %v5634_v59 = vld [vmem:[#allocation2 + $0x68c] ss:$16 sps:$4 sm:$0xff]  }
 0x109   :  { %2809 = vmatprep.subr.bf16.mxu0 %v5549_v60  ;;  %3096 = vmatprep.subr.bf16.mxu1 %v5552_v61  ;;  %v5629_v60 = vld [vmem:[#allocation2 + $0x680] ss:$16 sps:$4 sm:$0xff]   ;;  %v5632_v61 = vld [vmem:[#allocation2 + $0x688] ss:$16 sps:$4 sm:$0xff]  }
 0x10c   :  { %2810 = vmatpush1.bf16.msra.mxu0 %v5547_v62  ;;  %3097 = vmatpush1.bf16.msra.mxu1 %v5550_v63  ;;  %v5637_v62 = vld [vmem:[#allocation2 + $0x6a4] ss:$16 sps:$4 sm:$0xff]   ;;  %v5640_v63 = vld [vmem:[#allocation2 + $0x6ac] ss:$16 sps:$4 sm:$0xff]  }
 0x10d   :  { %2811 = vmatprep.subr.bf16.mxu0 %v5555_v0  ;;  %3098 = vmatprep.subr.bf16.mxu1 %v5558_v1  ;;  %v5635_v0 = vld [vmem:[#allocation2 + $0x6a0] ss:$16 sps:$4 sm:$0xff]   ;;  %v5638_v1 = vld [vmem:[#allocation2 + $0x6a8] ss:$16 sps:$4 sm:$0xff]  }
 0x110   :  { %2812 = vmatpush1.bf16.msra.mxu0 %v5553_v2  ;;  %3099 = vmatpush1.bf16.msra.mxu1 %v5556_v3  ;;  %v5643_v2 = vld [vmem:[#allocation2 + $0x6c4] ss:$16 sps:$4 sm:$0xff]   ;;  %v5646_v3 = vld [vmem:[#allocation2 + $0x6cc] ss:$16 sps:$4 sm:$0xff]  }
 0x111   :  { %2813 = vmatprep.subr.bf16.mxu0 %v5561_v4  ;;  %3100 = vmatprep.subr.bf16.mxu1 %v5564_v5  ;;  %v5641_v4 = vld [vmem:[#allocation2 + $0x6c0] ss:$16 sps:$4 sm:$0xff]   ;;  %v5644_v5 = vld [vmem:[#allocation2 + $0x6c8] ss:$16 sps:$4 sm:$0xff]  }
 0x114   :  { %2814 = vmatpush1.bf16.msra.mxu0 %v5559_v6  ;;  %3101 = vmatpush1.bf16.msra.mxu1 %v5562_v7  ;;  %v5649_v6 = vld [vmem:[#allocation2 + $0x6e4] ss:$16 sps:$4 sm:$0xff]   ;;  %v5652_v7 = vld [vmem:[#allocation2 + $0x6ec] ss:$16 sps:$4 sm:$0xff]  }
 0x115   :  { %2815 = vmatprep.subr.bf16.mxu0 %v5567_v8  ;;  %3102 = vmatprep.subr.bf16.mxu1 %v5570_v9  ;;  %v5647_v8 = vld [vmem:[#allocation2 + $0x6e0] ss:$16 sps:$4 sm:$0xff]   ;;  %v5650_v9 = vld [vmem:[#allocation2 + $0x6e8] ss:$16 sps:$4 sm:$0xff]  }
 0x118   :  { %2816 = vmatpush1.bf16.msra.mxu0 %v5565_v10  ;;  %3103 = vmatpush1.bf16.msra.mxu1 %v5568_v11  ;;  %v5655_v10 = vld [vmem:[#allocation2 + $0x704] ss:$16 sps:$4 sm:$0xff]   ;;  %v5658_v11 = vld [vmem:[#allocation2 + $0x70c] ss:$16 sps:$4 sm:$0xff]  }
 0x119   :  { %2817 = vmatprep.subr.bf16.mxu0 %v5573_v14  ;;  %3104 = vmatprep.subr.bf16.mxu1 %v5576_v15  ;;  %v5653_v14 = vld [vmem:[#allocation2 + $0x700] ss:$16 sps:$4 sm:$0xff]   ;;  %v5656_v15 = vld [vmem:[#allocation2 + $0x708] ss:$16 sps:$4 sm:$0xff]  }
 0x11c   :  { %2818 = vmatpush1.bf16.msra.mxu0 %v5571_v16  ;;  %3105 = vmatpush1.bf16.msra.mxu1 %v5574_v17  ;;  %v5661_v16 = vld [vmem:[#allocation2 + $0x724] ss:$16 sps:$4 sm:$0xff]   ;;  %v5664_v17 = vld [vmem:[#allocation2 + $0x72c] ss:$16 sps:$4 sm:$0xff]  }
 0x11d   :  { %2819 = vmatprep.subr.bf16.mxu0 %v5579_v18  ;;  %3106 = vmatprep.subr.bf16.mxu1 %v5582_v19  ;;  %v5659_v18 = vld [vmem:[#allocation2 + $0x720] ss:$16 sps:$4 sm:$0xff]   ;;  %v5662_v19 = vld [vmem:[#allocation2 + $0x728] ss:$16 sps:$4 sm:$0xff]  }
 0x120   :  { %2820 = vmatpush1.bf16.msra.mxu0 %v5577_v20  ;;  %3107 = vmatpush1.bf16.msra.mxu1 %v5580_v21  ;;  %v5667_v20 = vld [vmem:[#allocation2 + $0x744] ss:$16 sps:$4 sm:$0xff]   ;;  %v5670_v21 = vld [vmem:[#allocation2 + $0x74c] ss:$16 sps:$4 sm:$0xff]  }
 0x121   :  { %2821 = vmatprep.subr.bf16.mxu0 %v5585_v22  ;;  %3108 = vmatprep.subr.bf16.mxu1 %v5588_v23  ;;  %v5665_v22 = vld [vmem:[#allocation2 + $0x740] ss:$16 sps:$4 sm:$0xff]   ;;  %v5668_v23 = vld [vmem:[#allocation2 + $0x748] ss:$16 sps:$4 sm:$0xff]  }
 0x124   :  { %2822 = vmatpush1.bf16.msra.mxu0 %v5583_v24  ;;  %3109 = vmatpush1.bf16.msra.mxu1 %v5586_v25  ;;  %v5673_v24 = vld [vmem:[#allocation2 + $0x764] ss:$16 sps:$4 sm:$0xff]   ;;  %v5676_v25 = vld [vmem:[#allocation2 + $0x76c] ss:$16 sps:$4 sm:$0xff]  }
 0x125   :  { %2823 = vmatprep.subr.bf16.mxu0 %v5591_v26  ;;  %3110 = vmatprep.subr.bf16.mxu1 %v5594_v27  ;;  %v5671_v26 = vld [vmem:[#allocation2 + $0x760] ss:$16 sps:$4 sm:$0xff]   ;;  %v5674_v27 = vld [vmem:[#allocation2 + $0x768] ss:$16 sps:$4 sm:$0xff]  }
 0x128   :  { %2824 = vmatpush1.bf16.msra.mxu0 %v5589_v30  ;;  %3111 = vmatpush1.bf16.msra.mxu1 %v5592_v31  ;;  %v5677_v30 = vld [vmem:[#allocation2 + $0x780] ss:$16 sps:$4 sm:$0xff]   ;;  %v5680_v31 = vld [vmem:[#allocation2 + $0x788] ss:$16 sps:$4 sm:$0xff]  }
 0x129   :  { %2825 = vmatprep.subr.bf16.mxu0 %v5597_v32  ;;  %3112 = vmatprep.subr.bf16.mxu1 %v5600_v33  ;;  %v5685_v32 = vld [vmem:[#allocation2 + $0x7a4] ss:$16 sps:$4 sm:$0xff]   ;;  %v5688_v33 = vld [vmem:[#allocation2 + $0x7ac] ss:$16 sps:$4 sm:$0xff]  }
 0x12c   :  { %2826 = vmatpush1.bf16.msra.mxu0 %v5595_v34  ;;  %3113 = vmatpush1.bf16.msra.mxu1 %v5598_v35  ;;  %v5683_v34 = vld [vmem:[#allocation2 + $0x7a0] ss:$16 sps:$4 sm:$0xff]   ;;  %v5686_v35 = vld [vmem:[#allocation2 + $0x7a8] ss:$16 sps:$4 sm:$0xff]  }
 0x12d   :  { %2836 = vmatprep.subr.bf16.mxu0 %v5607_v39  ;;  %3123 = vmatprep.subr.bf16.mxu1 %v5610_v40  ;;  %v5694_v39 = vld [vmem:[#allocation2 + $0x7cc] ss:$16 sps:$4 sm:$0xff]  }
 0x12e   :  { %v5799_v40 = vld [vmem:[%s6584_s0 + $0x10] ss:$26 sps:$4 sm:$0xff]  }
 0x12f   :  { %2828 = vmatmul.mubr.bf16.vlgmr.msra.gmra.mrb[0].mxu0 %v278_v44  ;;  %3115 = vmatmul.mubr.bf16.vlgmr.msra.gmra.mrb[0].mxu1 %v278_v44  ;;  %v5697_v44 = vld [vmem:[#allocation2 + $0x7e4] ss:$16 sps:$4 sm:$0xff]  }
 0x130   :  { %2837 = vmatpush1.bf16.msra.mxu0 %v5605_v42  ;;  %3124 = vmatpush1.bf16.msra.mxu1 %v5608_v43  ;;  %v5689_v42 = vld [vmem:[#allocation2 + $0x7c0] ss:$16 sps:$4 sm:$0xff]   ;;  %v5692_v43 = vld [vmem:[#allocation2 + $0x7c8] ss:$16 sps:$4 sm:$0xff]  }
 0x131   :  { %2838 = vmatprep.subr.bf16.mxu0 %v5613_v45  ;;  %3125 = vmatprep.subr.bf16.mxu1 %v5616_v47  ;;  %v5700_v45 = vld [vmem:[#allocation2 + $0x7ec] ss:$16 sps:$4 sm:$0xff]   ;;  %v6508_v47 = vrot.slane %v5799_v40, %v6445_v53  ;;  %v5777_v40 = vld [vmem:[#allocation2 + $0x984] ss:$16 sps:$4 sm:$0xff]  }
 0x132   :  { %2868 = vmatprep.mubr.bf16.mxu0 %v281_v48  ;;  %3155 = vmatprep.mubr.bf16.mxu1 %v281_v48  ;;  %v6511_v48 = vrot.slane %v5801_v41, %v6445_v53  ;;  %v5780_v41 = vld [vmem:[#allocation2 + $0x98c] ss:$16 sps:$4 sm:$0xff]  }
 0x134   :  { %2839 = vmatpush1.bf16.msra.mxu0 %v5611_v36  ;;  %3126 = vmatpush1.bf16.msra.mxu1 %v5614_v37  ;;  %v206_v36 = vcombine.low %v6492_v12, %v6495_v13  ;;  %v5695_v37 = vld [vmem:[#allocation2 + $0x7e0] ss:$16 sps:$4 sm:$0xff]   ;;  %v5714_v12 = vld [vmem:[#allocation2 + $0x82c] ss:$16 sps:$4 sm:$0xff]  }
 0x135   :  { %2840 = vmatprep.subr.bf16.mxu0 %v5619_v49  ;;  %3127 = vmatprep.subr.bf16.mxu1 %v5622_v50  ;;  %v5698_v49 = vld [vmem:[#allocation2 + $0x7e8] ss:$16 sps:$4 sm:$0xff]   ;;  %v5705_v50 = vld [vmem:[#allocation2 + $0x804] ss:$16 sps:$4 sm:$0xff]  }
 0x138   :  { %2841 = vmatpush1.bf16.msra.mxu0 %v5617_v51  ;;  %3128 = vmatpush1.bf16.msra.mxu1 %v5620_v52  ;;  %v5708_v51 = vld [vmem:[#allocation2 + $0x80c] ss:$16 sps:$4 sm:$0xff]   ;;  %v241_v52 = vcombine.high %v6508_v47, %v6511_v48 }
 0x139   :  { %2842 = vmatprep.subr.bf16.mxu0 %v5625_v54  ;;  %3129 = vmatprep.subr.bf16.mxu1 %v5628_v55  ;;  %v280_v54 = vpack.c.bf16 %v206_v36, %v206_v36  ;;  %v5703_v55 = vld [vmem:[#allocation2 + $0x800] ss:$16 sps:$4 sm:$0xff]  }
 0x13a   :  { %v283_v13 = vpack.c.bf16 %v241_v52, %v241_v52  ;;  %v5781_v36 = vld [vmem:[#allocation2 + $0x9a0] ss:$16 sps:$4 sm:$0xff]  }
 0x13b   :  { %v5900_v52 = vld [vmem:[%s6584_s0 + $0x48] ss:$26 sps:$4 sm:$0xff]  }
 0x13c   :  { %2843 = vmatpush1.bf16.msra.mxu0 %v5623_v56  ;;  %3130 = vmatpush1.bf16.msra.mxu1 %v5626_v57  ;;  %v5706_v56 = vld [vmem:[#allocation2 + $0x808] ss:$16 sps:$4 sm:$0xff]   ;;  %v5711_v57 = vld [vmem:[#allocation2 + $0x824] ss:$16 sps:$4 sm:$0xff]  }
 0x13d   :  { %2844 = vmatprep.subr.bf16.mxu0 %v5631_v58  ;;  %3131 = vmatprep.subr.bf16.mxu1 %v5634_v59  ;;  %v5709_v58 = vld [vmem:[#allocation2 + $0x820] ss:$16 sps:$4 sm:$0xff]   ;;  %v5712_v59 = vld [vmem:[#allocation2 + $0x828] ss:$16 sps:$4 sm:$0xff]  }
 0x140   :  { %2845 = vmatpush1.bf16.msra.mxu0 %v5629_v60  ;;  %3132 = vmatpush1.bf16.msra.mxu1 %v5632_v61  ;;  %v5717_v60 = vld [vmem:[#allocation2 + $0x844] ss:$16 sps:$4 sm:$0xff]   ;;  %v5720_v61 = vld [vmem:[#allocation2 + $0x84c] ss:$16 sps:$4 sm:$0xff]  }
 0x141   :  { %2846 = vmatprep.subr.bf16.mxu0 %v5637_v62  ;;  %3133 = vmatprep.subr.bf16.mxu1 %v5640_v63  ;;  %v5715_v62 = vld [vmem:[#allocation2 + $0x840] ss:$16 sps:$4 sm:$0xff]   ;;  %v5718_v63 = vld [vmem:[#allocation2 + $0x848] ss:$16 sps:$4 sm:$0xff]  }
 0x144   :  { %2847 = vmatpush1.bf16.msra.mxu0 %v5635_v0  ;;  %3134 = vmatpush1.bf16.msra.mxu1 %v5638_v1  ;;  %v5723_v0 = vld [vmem:[#allocation2 + $0x864] ss:$16 sps:$4 sm:$0xff]   ;;  %v5726_v1 = vld [vmem:[#allocation2 + $0x86c] ss:$16 sps:$4 sm:$0xff]  }
 0x145   :  { %2848 = vmatprep.subr.bf16.mxu0 %v5643_v2  ;;  %3135 = vmatprep.subr.bf16.mxu1 %v5646_v3  ;;  %v5721_v2 = vld [vmem:[#allocation2 + $0x860] ss:$16 sps:$4 sm:$0xff]   ;;  %v5724_v3 = vld [vmem:[#allocation2 + $0x868] ss:$16 sps:$4 sm:$0xff]  }
 0x148   :  { %2849 = vmatpush1.bf16.msra.mxu0 %v5641_v4  ;;  %3136 = vmatpush1.bf16.msra.mxu1 %v5644_v5  ;;  %v5729_v4 = vld [vmem:[#allocation2 + $0x884] ss:$16 sps:$4 sm:$0xff]   ;;  %v5732_v5 = vld [vmem:[#allocation2 + $0x88c] ss:$16 sps:$4 sm:$0xff]  }
 0x149   :  { %2850 = vmatprep.subr.bf16.mxu0 %v5649_v6  ;;  %3137 = vmatprep.subr.bf16.mxu1 %v5652_v7  ;;  %v5727_v6 = vld [vmem:[#allocation2 + $0x880] ss:$16 sps:$4 sm:$0xff]   ;;  %v5730_v7 = vld [vmem:[#allocation2 + $0x888] ss:$16 sps:$4 sm:$0xff]  }
 0x14c   :  { %2851 = vmatpush1.bf16.msra.mxu0 %v5647_v8  ;;  %3138 = vmatpush1.bf16.msra.mxu1 %v5650_v9  ;;  %v5735_v8 = vld [vmem:[#allocation2 + $0x8a4] ss:$16 sps:$4 sm:$0xff]   ;;  %v5738_v9 = vld [vmem:[#allocation2 + $0x8ac] ss:$16 sps:$4 sm:$0xff]  }
 0x14d   :  { %2852 = vmatprep.subr.bf16.mxu0 %v5655_v10  ;;  %3139 = vmatprep.subr.bf16.mxu1 %v5658_v11  ;;  %v5733_v10 = vld [vmem:[#allocation2 + $0x8a0] ss:$16 sps:$4 sm:$0xff]   ;;  %v5736_v11 = vld [vmem:[#allocation2 + $0x8a8] ss:$16 sps:$4 sm:$0xff]  }
 0x150   :  { %2853 = vmatpush1.bf16.msra.mxu0 %v5653_v14  ;;  %3140 = vmatpush1.bf16.msra.mxu1 %v5656_v15  ;;  %v5741_v14 = vld [vmem:[#allocation2 + $0x8c4] ss:$16 sps:$4 sm:$0xff]   ;;  %v5744_v15 = vld [vmem:[#allocation2 + $0x8cc] ss:$16 sps:$4 sm:$0xff]  }
 0x151   :  { %2854 = vmatprep.subr.bf16.mxu0 %v5661_v16  ;;  %3141 = vmatprep.subr.bf16.mxu1 %v5664_v17  ;;  %v5739_v16 = vld [vmem:[#allocation2 + $0x8c0] ss:$16 sps:$4 sm:$0xff]   ;;  %v5742_v17 = vld [vmem:[#allocation2 + $0x8c8] ss:$16 sps:$4 sm:$0xff]  }
 0x154   :  { %2855 = vmatpush1.bf16.msra.mxu0 %v5659_v18  ;;  %3142 = vmatpush1.bf16.msra.mxu1 %v5662_v19  ;;  %v5747_v18 = vld [vmem:[#allocation2 + $0x8e4] ss:$16 sps:$4 sm:$0xff]   ;;  %v5750_v19 = vld [vmem:[#allocation2 + $0x8ec] ss:$16 sps:$4 sm:$0xff]  }
 0x155   :  { %2856 = vmatprep.subr.bf16.mxu0 %v5667_v20  ;;  %3143 = vmatprep.subr.bf16.mxu1 %v5670_v21  ;;  %v5745_v20 = vld [vmem:[#allocation2 + $0x8e0] ss:$16 sps:$4 sm:$0xff]   ;;  %v5748_v21 = vld [vmem:[#allocation2 + $0x8e8] ss:$16 sps:$4 sm:$0xff]  }
 0x158   :  { %2857 = vmatpush1.bf16.msra.mxu0 %v5665_v22  ;;  %3144 = vmatpush1.bf16.msra.mxu1 %v5668_v23  ;;  %v5753_v22 = vld [vmem:[#allocation2 + $0x904] ss:$16 sps:$4 sm:$0xff]   ;;  %v5756_v23 = vld [vmem:[#allocation2 + $0x90c] ss:$16 sps:$4 sm:$0xff]  }
 0x159   :  { %2858 = vmatprep.subr.bf16.mxu0 %v5673_v24  ;;  %3145 = vmatprep.subr.bf16.mxu1 %v5676_v25  ;;  %v5751_v24 = vld [vmem:[#allocation2 + $0x900] ss:$16 sps:$4 sm:$0xff]   ;;  %v5754_v25 = vld [vmem:[#allocation2 + $0x908] ss:$16 sps:$4 sm:$0xff]  }
 0x15c   :  { %2859 = vmatpush1.bf16.msra.mxu0 %v5671_v26  ;;  %3146 = vmatpush1.bf16.msra.mxu1 %v5674_v27  ;;  %v5759_v26 = vld [vmem:[#allocation2 + $0x924] ss:$16 sps:$4 sm:$0xff]   ;;  %v5762_v27 = vld [vmem:[#allocation2 + $0x92c] ss:$16 sps:$4 sm:$0xff]  }
 0x15d   :  { %2860 = vmatprep.subr.bf16.mxu0 %v5679_v28  ;;  %3147 = vmatprep.subr.bf16.mxu1 %v5682_v29  ;;  %v5757_v28 = vld [vmem:[#allocation2 + $0x920] ss:$16 sps:$4 sm:$0xff]   ;;  %v5760_v29 = vld [vmem:[#allocation2 + $0x928] ss:$16 sps:$4 sm:$0xff]  }
 0x160   :  { %2861 = vmatpush1.bf16.msra.mxu0 %v5677_v30  ;;  %3148 = vmatpush1.bf16.msra.mxu1 %v5680_v31  ;;  %v5765_v30 = vld [vmem:[#allocation2 + $0x944] ss:$16 sps:$4 sm:$0xff]   ;;  %v5768_v31 = vld [vmem:[#allocation2 + $0x94c] ss:$16 sps:$4 sm:$0xff]  }
 0x161   :  { %2862 = vmatprep.subr.bf16.mxu0 %v5685_v32  ;;  %3149 = vmatprep.subr.bf16.mxu1 %v5688_v33  ;;  %v5763_v32 = vld [vmem:[#allocation2 + $0x940] ss:$16 sps:$4 sm:$0xff]   ;;  %v5766_v33 = vld [vmem:[#allocation2 + $0x948] ss:$16 sps:$4 sm:$0xff]  }
 0x164   :  { %2863 = vmatpush1.bf16.msra.mxu0 %v5683_v34  ;;  %3150 = vmatpush1.bf16.msra.mxu1 %v5686_v35  ;;  %v5771_v34 = vld [vmem:[#allocation2 + $0x964] ss:$16 sps:$4 sm:$0xff]   ;;  %v5774_v35 = vld [vmem:[#allocation2 + $0x96c] ss:$16 sps:$4 sm:$0xff]  }
 0x165   :  { %2864 = vmatprep.subr.bf16.mxu0 %v5691_v38  ;;  %3151 = vmatprep.subr.bf16.mxu1 %v5694_v39  ;;  %v5769_v38 = vld [vmem:[#allocation2 + $0x960] ss:$16 sps:$4 sm:$0xff]   ;;  %v5772_v39 = vld [vmem:[#allocation2 + $0x968] ss:$16 sps:$4 sm:$0xff]  }
 0x168   :  { %2865 = vmatpush1.bf16.msra.mxu0 %v5689_v42  ;;  %3152 = vmatpush1.bf16.msra.mxu1 %v5692_v43  ;;  %v5775_v42 = vld [vmem:[#allocation2 + $0x980] ss:$16 sps:$4 sm:$0xff]   ;;  %v5778_v43 = vld [vmem:[#allocation2 + $0x988] ss:$16 sps:$4 sm:$0xff]  }
 0x169   :  { %2866 = vmatprep.subr.bf16.mxu0 %v5697_v44  ;;  %3153 = vmatprep.subr.bf16.mxu1 %v5700_v45  ;;  %v5783_v44 = vld [vmem:[#allocation2 + $0x9a4] ss:$16 sps:$4 sm:$0xff]   ;;  %v5786_v45 = vld [vmem:[#allocation2 + $0x9ac] ss:$16 sps:$4 sm:$0xff]  }
 0x16c   :  { %2867 = vmatpush1.bf16.msra.mxu0 %v5695_v37  ;;  %3154 = vmatpush1.bf16.msra.mxu1 %v5698_v49  ;;  %v5784_v37 = vld [vmem:[#allocation2 + $0x9a8] ss:$16 sps:$4 sm:$0xff]   ;;  %v5789_v49 = vld [vmem:[#allocation2 + $0x9c4] ss:$16 sps:$4 sm:$0xff]  }
 0x16d   :  { %2877 = vmatprep.subr.bf16.mxu0 %v5705_v50  ;;  %3164 = vmatprep.subr.bf16.mxu1 %v5708_v51  ;;  %v5792_v50 = vld [vmem:[#allocation2 + $0x9cc] ss:$16 sps:$4 sm:$0xff]  }
 0x16e   :  { %v5899_v51 = vld [vmem:[%s6584_s0 + $0x14] ss:$26 sps:$4 sm:$0xff]  }
 0x16f   :  { %2869 = vmatmul.mubr.bf16.vlgmr.msra.gmra.mrb[0].mxu0 %v280_v54  ;;  %3156 = vmatmul.mubr.bf16.vlgmr.msra.gmra.mrb[0].mxu1 %v280_v54  ;;  %v5787_v54 = vld [vmem:[#allocation2 + $0x9c0] ss:$16 sps:$4 sm:$0xff]  }
 0x170   :  { %2878 = vmatpush1.bf16.msra.mxu0 %v5703_v55  ;;  %3165 = vmatpush1.bf16.msra.mxu1 %v5706_v56  ;;  %v5790_v55 = vld [vmem:[#allocation2 + $0x9c8] ss:$16 sps:$4 sm:$0xff]   ;;  %v5795_v56 = vld [vmem:[#allocation2 + $0x9e4] ss:$16 sps:$4 sm:$0xff]  }
 0x171   :  { %2879 = vmatprep.subr.bf16.mxu0 %v5711_v57  ;;  %3166 = vmatprep.subr.bf16.mxu1 %v5714_v12  ;;  %v5798_v57 = vld [vmem:[#allocation2 + $0x9ec] ss:$16 sps:$4 sm:$0xff]   ;;  %v6524_v12 = vrot.slane %v5899_v51, %v6445_v53  ;;  %v5877_v51 = vld [vmem:[#allocation2 + $0xb84] ss:$16 sps:$4 sm:$0xff]  }
 0x172   :  { %2909 = vmatprep.mubr.bf16.mxu0 %v283_v13  ;;  %3196 = vmatprep.mubr.bf16.mxu1 %v283_v13  ;;  %v6527_v13 = vrot.slane %v5900_v52, %v6445_v53  ;;  %v5880_v52 = vld [vmem:[#allocation2 + $0xb8c] ss:$16 sps:$4 sm:$0xff]  }
 0x174   :  { %2880 = vmatpush1.bf16.msra.mxu0 %v5709_v58  ;;  %3167 = vmatpush1.bf16.msra.mxu1 %v5712_v59  ;;  %v240_v58 = vcombine.low %v6508_v47, %v6511_v48  ;;  %v5793_v59 = vld [vmem:[#allocation2 + $0x9e0] ss:$16 sps:$4 sm:$0xff]   ;;  %v5814_v47 = vld [vmem:[#allocation2 + $0xa2c] ss:$16 sps:$4 sm:$0xff]  }
 0x175   :  { %2881 = vmatprep.subr.bf16.mxu0 %v5717_v60  ;;  %3168 = vmatprep.subr.bf16.mxu1 %v5720_v61  ;;  %v5796_v60 = vld [vmem:[#allocation2 + $0x9e8] ss:$16 sps:$4 sm:$0xff]   ;;  %v5805_v61 = vld [vmem:[#allocation2 + $0xa04] ss:$16 sps:$4 sm:$0xff]  }
 0x178   :  { %2882 = vmatpush1.bf16.msra.mxu0 %v5715_v62  ;;  %3169 = vmatpush1.bf16.msra.mxu1 %v5718_v63  ;;  %v5808_v62 = vld [vmem:[#allocation2 + $0xa0c] ss:$16 sps:$4 sm:$0xff]   ;;  %v243_v63 = vcombine.high %v6524_v12, %v6527_v13 }
 0x179   :  { %2883 = vmatprep.subr.bf16.mxu0 %v5723_v0  ;;  %3170 = vmatprep.subr.bf16.mxu1 %v5726_v1  ;;  %v282_v0 = vpack.c.bf16 %v240_v58, %v240_v58  ;;  %v5803_v1 = vld [vmem:[#allocation2 + $0xa00] ss:$16 sps:$4 sm:$0xff]  }
 0x17a   :  { %v285_v48 = vpack.c.bf16 %v243_v63, %v243_v63  ;;  %v5881_v58 = vld [vmem:[#allocation2 + $0xba0] ss:$16 sps:$4 sm:$0xff]   ;;  %v5890_v63 = vld [vmem:[#allocation2 + $0xbc8] ss:$16 sps:$4 sm:$0xff]  }
 0x17c   :  { %2884 = vmatpush1.bf16.msra.mxu0 %v5721_v2  ;;  %3171 = vmatpush1.bf16.msra.mxu1 %v5724_v3  ;;  %v5806_v2 = vld [vmem:[#allocation2 + $0xa08] ss:$16 sps:$4 sm:$0xff]   ;;  %v5811_v3 = vld [vmem:[#allocation2 + $0xa24] ss:$16 sps:$4 sm:$0xff]  }
 0x17d   :  { %2885 = vmatprep.subr.bf16.mxu0 %v5729_v4  ;;  %3172 = vmatprep.subr.bf16.mxu1 %v5732_v5  ;;  %v5809_v4 = vld [vmem:[#allocation2 + $0xa20] ss:$16 sps:$4 sm:$0xff]   ;;  %v5812_v5 = vld [vmem:[#allocation2 + $0xa28] ss:$16 sps:$4 sm:$0xff]  }
 0x180   :  { %2886 = vmatpush1.bf16.msra.mxu0 %v5727_v6  ;;  %3173 = vmatpush1.bf16.msra.mxu1 %v5730_v7  ;;  %v5817_v6 = vld [vmem:[#allocation2 + $0xa44] ss:$16 sps:$4 sm:$0xff]   ;;  %v5820_v7 = vld [vmem:[#allocation2 + $0xa4c] ss:$16 sps:$4 sm:$0xff]  }
 0x181   :  { %2887 = vmatprep.subr.bf16.mxu0 %v5735_v8  ;;  %3174 = vmatprep.subr.bf16.mxu1 %v5738_v9  ;;  %v5815_v8 = vld [vmem:[#allocation2 + $0xa40] ss:$16 sps:$4 sm:$0xff]   ;;  %v5818_v9 = vld [vmem:[#allocation2 + $0xa48] ss:$16 sps:$4 sm:$0xff]  }
 0x184   :  { %2888 = vmatpush1.bf16.msra.mxu0 %v5733_v10  ;;  %3175 = vmatpush1.bf16.msra.mxu1 %v5736_v11  ;;  %v5823_v10 = vld [vmem:[#allocation2 + $0xa64] ss:$16 sps:$4 sm:$0xff]   ;;  %v5826_v11 = vld [vmem:[#allocation2 + $0xa6c] ss:$16 sps:$4 sm:$0xff]  }
 0x185   :  { %2889 = vmatprep.subr.bf16.mxu0 %v5741_v14  ;;  %3176 = vmatprep.subr.bf16.mxu1 %v5744_v15  ;;  %v5821_v14 = vld [vmem:[#allocation2 + $0xa60] ss:$16 sps:$4 sm:$0xff]   ;;  %v5824_v15 = vld [vmem:[#allocation2 + $0xa68] ss:$16 sps:$4 sm:$0xff]  }
 0x188   :  { %2890 = vmatpush1.bf16.msra.mxu0 %v5739_v16  ;;  %3177 = vmatpush1.bf16.msra.mxu1 %v5742_v17  ;;  %v5829_v16 = vld [vmem:[#allocation2 + $0xa84] ss:$16 sps:$4 sm:$0xff]   ;;  %v5832_v17 = vld [vmem:[#allocation2 + $0xa8c] ss:$16 sps:$4 sm:$0xff]  }
 0x189   :  { %2891 = vmatprep.subr.bf16.mxu0 %v5747_v18  ;;  %3178 = vmatprep.subr.bf16.mxu1 %v5750_v19  ;;  %v5827_v18 = vld [vmem:[#allocation2 + $0xa80] ss:$16 sps:$4 sm:$0xff]   ;;  %v5830_v19 = vld [vmem:[#allocation2 + $0xa88] ss:$16 sps:$4 sm:$0xff]  }
 0x18c   :  { %2892 = vmatpush1.bf16.msra.mxu0 %v5745_v20  ;;  %3179 = vmatpush1.bf16.msra.mxu1 %v5748_v21  ;;  %v5835_v20 = vld [vmem:[#allocation2 + $0xaa4] ss:$16 sps:$4 sm:$0xff]   ;;  %v5838_v21 = vld [vmem:[#allocation2 + $0xaac] ss:$16 sps:$4 sm:$0xff]  }
 0x18d   :  { %2893 = vmatprep.subr.bf16.mxu0 %v5753_v22  ;;  %3180 = vmatprep.subr.bf16.mxu1 %v5756_v23  ;;  %v5833_v22 = vld [vmem:[#allocation2 + $0xaa0] ss:$16 sps:$4 sm:$0xff]   ;;  %v5836_v23 = vld [vmem:[#allocation2 + $0xaa8] ss:$16 sps:$4 sm:$0xff]  }
 0x190   :  { %2894 = vmatpush1.bf16.msra.mxu0 %v5751_v24  ;;  %3181 = vmatpush1.bf16.msra.mxu1 %v5754_v25  ;;  %v5841_v24 = vld [vmem:[#allocation2 + $0xac4] ss:$16 sps:$4 sm:$0xff]   ;;  %v5844_v25 = vld [vmem:[#allocation2 + $0xacc] ss:$16 sps:$4 sm:$0xff]  }
 0x191   :  { %2895 = vmatprep.subr.bf16.mxu0 %v5759_v26  ;;  %3182 = vmatprep.subr.bf16.mxu1 %v5762_v27  ;;  %v5839_v26 = vld [vmem:[#allocation2 + $0xac0] ss:$16 sps:$4 sm:$0xff]   ;;  %v5842_v27 = vld [vmem:[#allocation2 + $0xac8] ss:$16 sps:$4 sm:$0xff]  }
 0x194   :  { %2896 = vmatpush1.bf16.msra.mxu0 %v5757_v28  ;;  %3183 = vmatpush1.bf16.msra.mxu1 %v5760_v29  ;;  %v5847_v28 = vld [vmem:[#allocation2 + $0xae4] ss:$16 sps:$4 sm:$0xff]   ;;  %v5850_v29 = vld [vmem:[#allocation2 + $0xaec] ss:$16 sps:$4 sm:$0xff]  }
 0x195   :  { %2897 = vmatprep.subr.bf16.mxu0 %v5765_v30  ;;  %3184 = vmatprep.subr.bf16.mxu1 %v5768_v31  ;;  %v5845_v30 = vld [vmem:[#allocation2 + $0xae0] ss:$16 sps:$4 sm:$0xff]   ;;  %v5848_v31 = vld [vmem:[#allocation2 + $0xae8] ss:$16 sps:$4 sm:$0xff]  }
 0x198   :  { %2898 = vmatpush1.bf16.msra.mxu0 %v5763_v32  ;;  %3185 = vmatpush1.bf16.msra.mxu1 %v5766_v33  ;;  %v5853_v32 = vld [vmem:[#allocation2 + $0xb04] ss:$16 sps:$4 sm:$0xff]   ;;  %v5856_v33 = vld [vmem:[#allocation2 + $0xb0c] ss:$16 sps:$4 sm:$0xff]  }
 0x199   :  { %2899 = vmatprep.subr.bf16.mxu0 %v5771_v34  ;;  %3186 = vmatprep.subr.bf16.mxu1 %v5774_v35  ;;  %v5851_v34 = vld [vmem:[#allocation2 + $0xb00] ss:$16 sps:$4 sm:$0xff]   ;;  %v5854_v35 = vld [vmem:[#allocation2 + $0xb08] ss:$16 sps:$4 sm:$0xff]  }
 0x19c   :  { %2900 = vmatpush1.bf16.msra.mxu0 %v5769_v38  ;;  %3187 = vmatpush1.bf16.msra.mxu1 %v5772_v39  ;;  %v5859_v38 = vld [vmem:[#allocation2 + $0xb24] ss:$16 sps:$4 sm:$0xff]   ;;  %v5862_v39 = vld [vmem:[#allocation2 + $0xb2c] ss:$16 sps:$4 sm:$0xff]  }
 0x19d   :  { %2901 = vmatprep.subr.bf16.mxu0 %v5777_v40  ;;  %3188 = vmatprep.subr.bf16.mxu1 %v5780_v41  ;;  %v5857_v40 = vld [vmem:[#allocation2 + $0xb20] ss:$16 sps:$4 sm:$0xff]   ;;  %v5860_v41 = vld [vmem:[#allocation2 + $0xb28] ss:$16 sps:$4 sm:$0xff]  }
 0x1a0   :  { %2902 = vmatpush1.bf16.msra.mxu0 %v5775_v42  ;;  %3189 = vmatpush1.bf16.msra.mxu1 %v5778_v43  ;;  %v5865_v42 = vld [vmem:[#allocation2 + $0xb44] ss:$16 sps:$4 sm:$0xff]   ;;  %v5868_v43 = vld [vmem:[#allocation2 + $0xb4c] ss:$16 sps:$4 sm:$0xff]  }
 0x1a1   :  { %2903 = vmatprep.subr.bf16.mxu0 %v5783_v44  ;;  %3190 = vmatprep.subr.bf16.mxu1 %v5786_v45  ;;  %v5863_v44 = vld [vmem:[#allocation2 + $0xb40] ss:$16 sps:$4 sm:$0xff]   ;;  %v5866_v45 = vld [vmem:[#allocation2 + $0xb48] ss:$16 sps:$4 sm:$0xff]  }
 0x1a4   :  { %2904 = vmatpush1.bf16.msra.mxu0 %v5781_v36  ;;  %3191 = vmatpush1.bf16.msra.mxu1 %v5784_v37  ;;  %v5871_v36 = vld [vmem:[#allocation2 + $0xb64] ss:$16 sps:$4 sm:$0xff]   ;;  %v5874_v37 = vld [vmem:[#allocation2 + $0xb6c] ss:$16 sps:$4 sm:$0xff]  }
 0x1a5   :  { %2905 = vmatprep.subr.bf16.mxu0 %v5789_v49  ;;  %3192 = vmatprep.subr.bf16.mxu1 %v5792_v50  ;;  %v5869_v49 = vld [vmem:[#allocation2 + $0xb60] ss:$16 sps:$4 sm:$0xff]   ;;  %v5872_v50 = vld [vmem:[#allocation2 + $0xb68] ss:$16 sps:$4 sm:$0xff]  }
 0x1a8   :  { %2906 = vmatpush1.bf16.msra.mxu0 %v5787_v54  ;;  %3193 = vmatpush1.bf16.msra.mxu1 %v5790_v55  ;;  %v5875_v54 = vld [vmem:[#allocation2 + $0xb80] ss:$16 sps:$4 sm:$0xff]   ;;  %v5878_v55 = vld [vmem:[#allocation2 + $0xb88] ss:$16 sps:$4 sm:$0xff]  }
 0x1a9   :  { %2907 = vmatprep.subr.bf16.mxu0 %v5795_v56  ;;  %3194 = vmatprep.subr.bf16.mxu1 %v5798_v57  ;;  %v5883_v56 = vld [vmem:[#allocation2 + $0xba4] ss:$16 sps:$4 sm:$0xff]   ;;  %v5886_v57 = vld [vmem:[#allocation2 + $0xbac] ss:$16 sps:$4 sm:$0xff]  }
 0x1ac   :  { %2908 = vmatpush1.bf16.msra.mxu0 %v5793_v59  ;;  %3195 = vmatpush1.bf16.msra.mxu1 %v5796_v60  ;;  %v5884_v59 = vld [vmem:[#allocation2 + $0xba8] ss:$16 sps:$4 sm:$0xff]   ;;  %v5889_v60 = vld [vmem:[#allocation2 + $0xbc4] ss:$16 sps:$4 sm:$0xff]  }
 0x1ad   :  { %2918 = vmatprep.subr.bf16.mxu0 %v5805_v61  ;;  %3205 = vmatprep.subr.bf16.mxu1 %v5808_v62  ;;  %v5892_v61 = vld [vmem:[#allocation2 + $0xbcc] ss:$16 sps:$4 sm:$0xff]   ;;  %v5887_v62 = vld [vmem:[#allocation2 + $0xbc0] ss:$16 sps:$4 sm:$0xff]  }
 0x1af   :  { %2910 = vmatmul.mubr.bf16.vlgmr.msra.gmra.mrb[0].mxu0 %v282_v0  ;;  %3197 = vmatmul.mubr.bf16.vlgmr.msra.gmra.mrb[0].mxu1 %v282_v0  ;;  %v5895_v0 = vld [vmem:[#allocation2 + $0xbe4] ss:$16 sps:$4 sm:$0xff]  }
 0x1b0   :  { %2919 = vmatpush1.bf16.msra.mxu0 %v5803_v1  ;;  %3206 = vmatpush1.bf16.msra.mxu1 %v5806_v2  ;;  %v5898_v1 = vld [vmem:[#allocation2 + $0xbec] ss:$16 sps:$4 sm:$0xff]   ;;  %v242_v2 = vcombine.low %v6524_v12, %v6527_v13  ;;  %v5925_v12 = vld [vmem:[%s6584_s0 + $0x18] ss:$26 sps:$4 sm:$0x33]  }
 0x1b1   :  { %2920 = vmatprep.subr.bf16.mxu0 %v5811_v3  ;;  %3207 = vmatprep.subr.bf16.mxu1 %v5814_v47  ;;  %v5893_v3 = vld [vmem:[#allocation2 + $0xbe0] ss:$16 sps:$4 sm:$0xff]   ;;  %v5896_v47 = vld [vmem:[#allocation2 + $0xbe8] ss:$16 sps:$4 sm:$0xff]  }
 0x1b2   :  { %2950 = vmatprep.mubr.bf16.mxu0 %v285_v48  ;;  %3237 = vmatprep.mubr.bf16.mxu1 %v285_v48  ;;  %v5903_v48 = vld [vmem:[#allocation2 + $0xc04] ss:$16 sps:$4 sm:$0xff]  }
 0x1b3   :  { %v5926_v13 = vld [vmem:[%s6584_s0 + $0x4c] ss:$26 sps:$4 sm:$0x33]  }
 0x1b4   :  { %2921 = vmatpush1.bf16.msra.mxu0 %v5809_v4  ;;  %3208 = vmatpush1.bf16.msra.mxu1 %v5812_v5  ;;  %v5906_v4 = vld [vmem:[#allocation2 + $0xc0c] ss:$16 sps:$4 sm:$0xff]   ;;  %v284_v5 = vpack.c.bf16 %v242_v2, %v242_v2  ;;  %v5983_v2 = vld [vmem:[#allocation7 + $0x124] ss:$16 sps:$4 sm:$0xff]  }
 0x1b5   :  { %2922 = vmatprep.subr.bf16.mxu0 %v5817_v6  ;;  %3209 = vmatprep.subr.bf16.mxu1 %v5820_v7  ;;  %v5901_v6 = vld [vmem:[#allocation2 + $0xc00] ss:$16 sps:$4 sm:$0xff]   ;;  %v5904_v7 = vld [vmem:[#allocation2 + $0xc08] ss:$16 sps:$4 sm:$0xff]  }
 0x1b8   :  { %2923 = vmatpush1.bf16.msra.mxu0 %v5815_v8  ;;  %3210 = vmatpush1.bf16.msra.mxu1 %v5818_v9  ;;  %v5909_v8 = vld [vmem:[#allocation2 + $0xc24] ss:$16 sps:$4 sm:$0xff]   ;;  %v5912_v9 = vld [vmem:[#allocation2 + $0xc2c] ss:$16 sps:$4 sm:$0xff]  }
 0x1b9   :  { %2924 = vmatprep.subr.bf16.mxu0 %v5823_v10  ;;  %3211 = vmatprep.subr.bf16.mxu1 %v5826_v11  ;;  %v5907_v10 = vld [vmem:[#allocation2 + $0xc20] ss:$16 sps:$4 sm:$0xff]   ;;  %v5910_v11 = vld [vmem:[#allocation2 + $0xc28] ss:$16 sps:$4 sm:$0xff]  }
 0x1bc   :  { %2925 = vmatpush1.bf16.msra.mxu0 %v5821_v14  ;;  %3212 = vmatpush1.bf16.msra.mxu1 %v5824_v15  ;;  %v5915_v14 = vld [vmem:[#allocation2 + $0xc44] ss:$16 sps:$4 sm:$0xff]   ;;  %v5918_v15 = vld [vmem:[#allocation2 + $0xc4c] ss:$16 sps:$4 sm:$0xff]  }
 0x1bd   :  { %2926 = vmatprep.subr.bf16.mxu0 %v5829_v16  ;;  %3213 = vmatprep.subr.bf16.mxu1 %v5832_v17  ;;  %v6326_v16 = vmov 0   ;;  %v252_v17 = vrot.slane %v5925_v12, %v6445_v53  ;;  %v5993_v12 = vld [vmem:[#allocation7 + $0x160] ss:$16 sps:$4 sm:$0xff]  }
 0x1c0   :  { %2927 = vmatpush1.bf16.msra.mxu0 %v5827_v18  ;;  %3214 = vmatpush1.bf16.msra.mxu1 %v5830_v19  ;;  %v259_v18 = vrot.slane %v5926_v13, %v6445_v53  ;;  %v5913_v19 = vld [vmem:[#allocation2 + $0xc40] ss:$16 sps:$4 sm:$0xff]   ;;  %v5927_v53 = vld [vmem:[#allocation7] ss:$16 sps:$4 sm:$0xff]   ;;  %v5996_v13 = vld [vmem:[#allocation7 + $0x168] ss:$16 sps:$4 sm:$0xff]  }
 0x1c1   :  { %2928 = vmatprep.subr.bf16.mxu0 %v5835_v20  ;;  %3215 = vmatprep.subr.bf16.mxu1 %v5838_v21  ;;  %v5916_v20 = vld [vmem:[#allocation2 + $0xc48] ss:$16 sps:$4 sm:$0xff]   ;;  %v5921_v21 = vld [vmem:[#allocation2 + $0xc64] ss:$16 sps:$4 sm:$0xff]  }
 0x1c4   :  { %2929 = vmatpush1.bf16.msra.mxu0 %v5833_v22  ;;  %3216 = vmatpush1.bf16.msra.mxu1 %v5836_v23  ;;  %v5924_v22 = vld [vmem:[#allocation2 + $0xc6c] ss:$16 sps:$4 sm:$0xff]   ;;  %v260_v23 = vcombine.low %v252_v17, %v259_v18  ;;  %v6010_v17 = vld [vmem:[#allocation7 + $0x1ac] ss:$16 sps:$4 sm:$0xff]   ;;  %v6005_v18 = vld [vmem:[#allocation7 + $0x1a0] ss:$16 sps:$4 sm:$0xff]  }
 0x1c5   :  { %2930 = vmatprep.subr.bf16.mxu0 %v5841_v24  ;;  %3217 = vmatprep.subr.bf16.mxu1 %v5844_v25  ;;  %v5919_v24 = vld [vmem:[#allocation2 + $0xc60] ss:$16 sps:$4 sm:$0xff]   ;;  %v5922_v25 = vld [vmem:[#allocation2 + $0xc68] ss:$16 sps:$4 sm:$0xff]  }
 0x1c8   :  { %2931 = vmatpush1.bf16.msra.mxu0 %v5839_v26  ;;  %3218 = vmatpush1.bf16.msra.mxu1 %v5842_v27  ;;  %v5929_v26 = vld [vmem:[#allocation7 + $0x4] ss:$16 sps:$4 sm:$0xff]   ;;  %v5932_v27 = vld [vmem:[#allocation7 + $0xc] ss:$16 sps:$4 sm:$0xff]  }
 0x1c9   :  { %2932 = vmatprep.subr.bf16.mxu0 %v5847_v28  ;;  %3219 = vmatprep.subr.bf16.mxu1 %v5850_v29  ;;  %v286_v28 = vpack.c.bf16 %v260_v23, %v260_v23  ;;  %v5930_v29 = vld [vmem:[#allocation7 + $0x8] ss:$16 sps:$4 sm:$0xff]  }
 0x1ca   :  { %v6014_v23 = vld [vmem:[#allocation7 + $0x1c8] ss:$16 sps:$4 sm:$0xff]  }
 0x1cc   :  { %2933 = vmatpush1.bf16.msra.mxu0 %v5845_v30  ;;  %3220 = vmatpush1.bf16.msra.mxu1 %v5848_v31  ;;  %v5935_v30 = vld [vmem:[#allocation7 + $0x24] ss:$16 sps:$4 sm:$0xff]   ;;  %v5938_v31 = vld [vmem:[#allocation7 + $0x2c] ss:$16 sps:$4 sm:$0xff]  }
 0x1cd   :  { %2934 = vmatprep.subr.bf16.mxu0 %v5853_v32  ;;  %3221 = vmatprep.subr.bf16.mxu1 %v5856_v33  ;;  %v5933_v32 = vld [vmem:[#allocation7 + $0x20] ss:$16 sps:$4 sm:$0xff]   ;;  %v5936_v33 = vld [vmem:[#allocation7 + $0x28] ss:$16 sps:$4 sm:$0xff]  }
 0x1d0   :  { %2935 = vmatpush1.bf16.msra.mxu0 %v5851_v34  ;;  %3222 = vmatpush1.bf16.msra.mxu1 %v5854_v35  ;;  %v5941_v34 = vld [vmem:[#allocation7 + $0x44] ss:$16 sps:$4 sm:$0xff]   ;;  %v5944_v35 = vld [vmem:[#allocation7 + $0x4c] ss:$16 sps:$4 sm:$0xff]  }
 0x1d1   :  { %2936 = vmatprep.subr.bf16.mxu0 %v5859_v38  ;;  %3223 = vmatprep.subr.bf16.mxu1 %v5862_v39  ;;  %v5939_v38 = vld [vmem:[#allocation7 + $0x40] ss:$16 sps:$4 sm:$0xff]   ;;  %v5942_v39 = vld [vmem:[#allocation7 + $0x48] ss:$16 sps:$4 sm:$0xff]  }
 0x1d4   :  { %2937 = vmatpush1.bf16.msra.mxu0 %v5857_v40  ;;  %3224 = vmatpush1.bf16.msra.mxu1 %v5860_v41  ;;  %v5947_v40 = vld [vmem:[#allocation7 + $0x64] ss:$16 sps:$4 sm:$0xff]   ;;  %v5950_v41 = vld [vmem:[#allocation7 + $0x6c] ss:$16 sps:$4 sm:$0xff]  }
 0x1d5   :  { %2938 = vmatprep.subr.bf16.mxu0 %v5865_v42  ;;  %3225 = vmatprep.subr.bf16.mxu1 %v5868_v43  ;;  %v5945_v42 = vld [vmem:[#allocation7 + $0x60] ss:$16 sps:$4 sm:$0xff]   ;;  %v5948_v43 = vld [vmem:[#allocation7 + $0x68] ss:$16 sps:$4 sm:$0xff]  }
 0x1d8   :  { %2939 = vmatpush1.bf16.msra.mxu0 %v5863_v44  ;;  %3226 = vmatpush1.bf16.msra.mxu1 %v5866_v45  ;;  %v5953_v44 = vld [vmem:[#allocation7 + $0x84] ss:$16 sps:$4 sm:$0xff]   ;;  %v5956_v45 = vld [vmem:[#allocation7 + $0x8c] ss:$16 sps:$4 sm:$0xff]  }
 0x1d9   :  { %2940 = vmatprep.subr.bf16.mxu0 %v5871_v36  ;;  %3227 = vmatprep.subr.bf16.mxu1 %v5874_v37  ;;  %v5951_v36 = vld [vmem:[#allocation7 + $0x80] ss:$16 sps:$4 sm:$0xff]   ;;  %v5954_v37 = vld [vmem:[#allocation7 + $0x88] ss:$16 sps:$4 sm:$0xff]  }
 0x1dc   :  { %2941 = vmatpush1.bf16.msra.mxu0 %v5869_v49  ;;  %3228 = vmatpush1.bf16.msra.mxu1 %v5872_v50  ;;  %v5959_v49 = vld [vmem:[#allocation7 + $0xa4] ss:$16 sps:$4 sm:$0xff]   ;;  %v5962_v50 = vld [vmem:[#allocation7 + $0xac] ss:$16 sps:$4 sm:$0xff]  }
 0x1dd   :  { %2942 = vmatprep.subr.bf16.mxu0 %v5877_v51  ;;  %3229 = vmatprep.subr.bf16.mxu1 %v5880_v52  ;;  %v5957_v51 = vld [vmem:[#allocation7 + $0xa0] ss:$16 sps:$4 sm:$0xff]   ;;  %v5960_v52 = vld [vmem:[#allocation7 + $0xa8] ss:$16 sps:$4 sm:$0xff]  }
 0x1e0   :  { %2943 = vmatpush1.bf16.msra.mxu0 %v5875_v54  ;;  %3230 = vmatpush1.bf16.msra.mxu1 %v5878_v55  ;;  %v5965_v54 = vld [vmem:[#allocation7 + $0xc4] ss:$16 sps:$4 sm:$0xff]   ;;  %v5968_v55 = vld [vmem:[#allocation7 + $0xcc] ss:$16 sps:$4 sm:$0xff]  }
 0x1e1   :  { %2944 = vmatprep.subr.bf16.mxu0 %v5883_v56  ;;  %3231 = vmatprep.subr.bf16.mxu1 %v5886_v57  ;;  %v5963_v56 = vld [vmem:[#allocation7 + $0xc0] ss:$16 sps:$4 sm:$0xff]   ;;  %v5966_v57 = vld [vmem:[#allocation7 + $0xc8] ss:$16 sps:$4 sm:$0xff]  }
 0x1e4   :  { %2945 = vmatpush1.bf16.msra.mxu0 %v5881_v58  ;;  %3232 = vmatpush1.bf16.msra.mxu1 %v5884_v59  ;;  %v5971_v58 = vld [vmem:[#allocation7 + $0xe4] ss:$16 sps:$4 sm:$0xff]   ;;  %v5974_v59 = vld [vmem:[#allocation7 + $0xec] ss:$16 sps:$4 sm:$0xff]  }
 0x1e5   :  { %2946 = vmatprep.subr.bf16.mxu0 %v5889_v60  ;;  %3233 = vmatprep.subr.bf16.mxu1 %v5892_v61  ;;  %v5969_v60 = vld [vmem:[#allocation7 + $0xe0] ss:$16 sps:$4 sm:$0xff]   ;;  %v5972_v61 = vld [vmem:[#allocation7 + $0xe8] ss:$16 sps:$4 sm:$0xff]  }
 0x1e8   :  { %2947 = vmatpush1.bf16.msra.mxu0 %v5887_v62  ;;  %3234 = vmatpush1.bf16.msra.mxu1 %v5890_v63  ;;  %v5977_v62 = vld [vmem:[#allocation7 + $0x104] ss:$16 sps:$4 sm:$0xff]   ;;  %v5980_v63 = vld [vmem:[#allocation7 + $0x10c] ss:$16 sps:$4 sm:$0xff]  }
 0x1e9   :  { %2948 = vmatprep.subr.bf16.mxu0 %v5895_v0  ;;  %3235 = vmatprep.subr.bf16.mxu1 %v5898_v1  ;;  %v5975_v0 = vld [vmem:[#allocation7 + $0x100] ss:$16 sps:$4 sm:$0xff]   ;;  %v5978_v1 = vld [vmem:[#allocation7 + $0x108] ss:$16 sps:$4 sm:$0xff]  }
 0x1ec   :  { %2949 = vmatpush1.bf16.msra.mxu0 %v5893_v3  ;;  %3236 = vmatpush1.bf16.msra.mxu1 %v5896_v47  ;;  %v5986_v3 = vld [vmem:[#allocation7 + $0x12c] ss:$16 sps:$4 sm:$0xff]   ;;  %v5981_v47 = vld [vmem:[#allocation7 + $0x120] ss:$16 sps:$4 sm:$0xff]  }
 0x1ed   :  { %2959 = vmatprep.subr.bf16.mxu0 %v5903_v48  ;;  %3246 = vmatprep.subr.bf16.mxu1 %v5906_v4  ;;  %v5984_v48 = vld [vmem:[#allocation7 + $0x128] ss:$16 sps:$4 sm:$0xff]   ;;  %v5989_v4 = vld [vmem:[#allocation7 + $0x144] ss:$16 sps:$4 sm:$0xff]  }
 0x1ef   :  { %2951 = vmatmul.mubr.bf16.vlgmr.msra.gmra.mrb[0].mxu0 %v284_v5  ;;  %3238 = vmatmul.mubr.bf16.vlgmr.msra.gmra.mrb[0].mxu1 %v284_v5  ;;  %v5992_v5 = vld [vmem:[#allocation7 + $0x14c] ss:$16 sps:$4 sm:$0xff]  }
 0x1f0   :  { %2960 = vmatpush1.bf16.msra.mxu0 %v5901_v6  ;;  %3247 = vmatpush1.bf16.msra.mxu1 %v5904_v7  ;;  %v5987_v6 = vld [vmem:[#allocation7 + $0x140] ss:$16 sps:$4 sm:$0xff]   ;;  %v5990_v7 = vld [vmem:[#allocation7 + $0x148] ss:$16 sps:$4 sm:$0xff]  }
 0x1f1   :  { %2961 = vmatprep.subr.bf16.mxu0 %v5909_v8  ;;  %3248 = vmatprep.subr.bf16.mxu1 %v5912_v9  ;;  %v5995_v8 = vld [vmem:[#allocation7 + $0x164] ss:$16 sps:$4 sm:$0xff]   ;;  %v5998_v9 = vld [vmem:[#allocation7 + $0x16c] ss:$16 sps:$4 sm:$0xff]  }
 0x1f2   :  { %2991 = vmatprep.mubr.bf16.mxu0 %v6326_v16  ;;  %3278 = vmatprep.mubr.bf16.mxu1 %v6326_v16  ;;  %v6007_v16 = vld [vmem:[#allocation7 + $0x1a4] ss:$16 sps:$4 sm:$0xff]  }
 0x1f4   :  { %2962 = vmatpush1.bf16.msra.mxu0 %v5907_v10  ;;  %3249 = vmatpush1.bf16.msra.mxu1 %v5910_v11  ;;  %v6001_v10 = vld [vmem:[#allocation7 + $0x184] ss:$16 sps:$4 sm:$0xff]   ;;  %v6004_v11 = vld [vmem:[#allocation7 + $0x18c] ss:$16 sps:$4 sm:$0xff]  }
 0x1f5   :  { %2963 = vmatprep.subr.bf16.mxu0 %v5915_v14  ;;  %3250 = vmatprep.subr.bf16.mxu1 %v5918_v15  ;;  %v5999_v14 = vld [vmem:[#allocation7 + $0x180] ss:$16 sps:$4 sm:$0xff]   ;;  %v6002_v15 = vld [vmem:[#allocation7 + $0x188] ss:$16 sps:$4 sm:$0xff]  }
 0x1f8   :  { %2964 = vmatpush1.bf16.msra.mxu0 %v5913_v19  ;;  %3251 = vmatpush1.bf16.msra.mxu1 %v5916_v20  ;;  %v6008_v19 = vld [vmem:[#allocation7 + $0x1a8] ss:$16 sps:$4 sm:$0xff]   ;;  %v6013_v20 = vld [vmem:[#allocation7 + $0x1c4] ss:$16 sps:$4 sm:$0xff]  }
 0x1f9   :  { %2965 = vmatprep.subr.bf16.mxu0 %v5921_v21  ;;  %3252 = vmatprep.subr.bf16.mxu1 %v5924_v22  ;;  %v6016_v21 = vld [vmem:[#allocation7 + $0x1cc] ss:$16 sps:$4 sm:$0xff]   ;;  %v6011_v22 = vld [vmem:[#allocation7 + $0x1c0] ss:$16 sps:$4 sm:$0xff]  }
 0x1fc   :  { %2966 = vmatpush1.bf16.msra.mxu0 %v5919_v24  ;;  %3253 = vmatpush1.bf16.msra.mxu1 %v5922_v25  ;;  %v6019_v24 = vld [vmem:[#allocation7 + $0x1e4] ss:$16 sps:$4 sm:$0xff]   ;;  %v6022_v25 = vld [vmem:[#allocation7 + $0x1ec] ss:$16 sps:$4 sm:$0xff]  }
 0x1fd   :  { %4085 = vmatprep.subr.bf16.mxu0 %v5929_v26  ;;  %4167 = vmatprep.subr.bf16.mxu1 %v5932_v27  ;;  %v6017_v26 = vld [vmem:[#allocation7 + $0x1e0] ss:$16 sps:$4 sm:$0xff]   ;;  %v6020_v27 = vld [vmem:[#allocation7 + $0x1e8] ss:$16 sps:$4 sm:$0xff]  }
 0x1ff   :  { %5021 = vmatmul.mubr.msk.bf16.vlgmr.msra.gmra.mrb[0].mxu0 %vm2709_vm0, %v286_v28  ;;  %5022 = vmatmul.mubr.msk.bf16.vlgmr.msra.gmra.mrb[0].mxu1 %vm2709_vm0, %v286_v28  ;;  %v6025_v28 = vld [vmem:[#allocation7 + $0x204] ss:$16 sps:$4 sm:$0xff]  }
 0x200   :  { %4086 = vmatpush1.bf16.msra.mxu0 %v5927_v53  ;;  %4168 = vmatpush1.bf16.msra.mxu1 %v5930_v29  ;;  %v6028_v53 = vld [vmem:[#allocation7 + $0x20c] ss:$16 sps:$4 sm:$0xff]   ;;  %v691_v29 = vsub.s32 0, %v6442_v46 }
 0x201   :  { %4087 = vmatprep.subr.bf16.mxu0 %v5935_v30  ;;  %4169 = vmatprep.subr.bf16.mxu1 %v5938_v31  ;;  %v6544_v30 = vld [vmem:[#allocation5] sm:$0xf]  ;;  %v695_v31 = vsub.s32 1, %v6442_v46 }
 0x204   :  { %4088 = vmatpush1.bf16.msra.mxu0 %v5933_v32  ;;  %4170 = vmatpush1.bf16.msra.mxu1 %v5936_v33  ;;  %v703_v32 = vsub.s32 3, %v6442_v46  ;;  %v692_v33 = vrot.slane %v6544_v30, %v691_v29 }
 0x205   :  { %4089 = vmatprep.subr.bf16.mxu0 %v5941_v34  ;;  %4171 = vmatprep.subr.bf16.mxu1 %v5944_v35  ;;  %v696_v34 = vrot.slane %v6544_v30, %v695_v31 }
 0x206   :  { %v704_v35 = vrot.slane %v6544_v30, %v703_v32 }
 0x208   :  { %4090 = vmatpush1.bf16.msra.mxu0 %v5939_v38  ;;  %4172 = vmatpush1.bf16.msra.mxu1 %v5942_v39 }
 0x209   :  { %4091 = vmatprep.subr.bf16.mxu0 %v5947_v40  ;;  %4173 = vmatprep.subr.bf16.mxu1 %v5950_v41 }
 0x20c   :  { %4092 = vmatpush1.bf16.msra.mxu0 %v5945_v42  ;;  %4174 = vmatpush1.bf16.msra.mxu1 %v5948_v43 }
 0x20d   :  { %4093 = vmatprep.subr.bf16.mxu0 %v5953_v44  ;;  %4175 = vmatprep.subr.bf16.mxu1 %v5956_v45 }
 0x210   :  { %4094 = vmatpush1.bf16.msra.mxu0 %v5951_v36  ;;  %4176 = vmatpush1.bf16.msra.mxu1 %v5954_v37 }
 0x211   :  { %4095 = vmatprep.subr.bf16.mxu0 %v5959_v49  ;;  %4177 = vmatprep.subr.bf16.mxu1 %v5962_v50 }
 0x214   :  { %4096 = vmatpush1.bf16.msra.mxu0 %v5957_v51  ;;  %4178 = vmatpush1.bf16.msra.mxu1 %v5960_v52 }
 0x215   :  { %4097 = vmatprep.subr.bf16.mxu0 %v5965_v54  ;;  %4179 = vmatprep.subr.bf16.mxu1 %v5968_v55  ;;  %v6023_v55 = vld [vmem:[#allocation7 + $0x200] ss:$16 sps:$4 sm:$0xff]  }
 0x218   :  { %4098 = vmatpush1.bf16.msra.mxu0 %v5963_v56  ;;  %4180 = vmatpush1.bf16.msra.mxu1 %v5966_v57  ;;  %v6026_v56 = vld [vmem:[#allocation7 + $0x208] ss:$16 sps:$4 sm:$0xff]  }
 0x219   :  { %4099 = vmatprep.subr.bf16.mxu0 %v5971_v58  ;;  %4181 = vmatprep.subr.bf16.mxu1 %v5974_v59  ;;  %v6031_v58 = vld [vmem:[#allocation7 + $0x224] ss:$16 sps:$4 sm:$0xff]   ;;  %v6034_v59 = vld [vmem:[#allocation7 + $0x22c] ss:$16 sps:$4 sm:$0xff]  }
 0x21c   :  { %4100 = vmatpush1.bf16.msra.mxu0 %v5969_v60  ;;  %4182 = vmatpush1.bf16.msra.mxu1 %v5972_v61  ;;  %v6029_v61 = vld [vmem:[#allocation7 + $0x220] ss:$16 sps:$4 sm:$0xff]  }
 0x21d   :  { %4101 = vmatprep.subr.bf16.mxu0 %v5977_v62  ;;  %4183 = vmatprep.subr.bf16.mxu1 %v5980_v63  ;;  %v6032_v62 = vld [vmem:[#allocation7 + $0x228] ss:$16 sps:$4 sm:$0xff]   ;;  %v6037_v63 = vld [vmem:[#allocation7 + $0x244] ss:$16 sps:$4 sm:$0xff]  }
 0x220   :  { %4102 = vmatpush1.bf16.msra.mxu0 %v5975_v0  ;;  %4184 = vmatpush1.bf16.msra.mxu1 %v5978_v1  ;;  %v6040_v0 = vld [vmem:[#allocation7 + $0x24c] ss:$16 sps:$4 sm:$0xff]   ;;  %v6035_v1 = vld [vmem:[#allocation7 + $0x240] ss:$16 sps:$4 sm:$0xff]  }
 0x221   :  { %4103 = vmatprep.subr.bf16.mxu0 %v5983_v2  ;;  %4185 = vmatprep.subr.bf16.mxu1 %v5986_v3  ;;  %v6038_v2 = vld [vmem:[#allocation7 + $0x248] ss:$16 sps:$4 sm:$0xff]   ;;  %v6043_v3 = vld [vmem:[#allocation7 + $0x264] ss:$16 sps:$4 sm:$0xff]  }
 0x224   :  { %4104 = vmatpush1.bf16.msra.mxu0 %v5981_v47  ;;  %4186 = vmatpush1.bf16.msra.mxu1 %v5984_v48  ;;  %v6046_v47 = vld [vmem:[#allocation7 + $0x26c] ss:$16 sps:$4 sm:$0xff]   ;;  %v6041_v48 = vld [vmem:[#allocation7 + $0x260] ss:$16 sps:$4 sm:$0xff]  }
 0x225   :  { %4105 = vmatprep.subr.bf16.mxu0 %v5989_v4  ;;  %4187 = vmatprep.subr.bf16.mxu1 %v5992_v5  ;;  %v6044_v4 = vld [vmem:[#allocation7 + $0x268] ss:$16 sps:$4 sm:$0xff]   ;;  %v6049_v5 = vld [vmem:[#allocation7 + $0x284] ss:$16 sps:$4 sm:$0xff]  }
 0x228   :  { %4106 = vmatpush1.bf16.msra.mxu0 %v5987_v6  ;;  %4188 = vmatpush1.bf16.msra.mxu1 %v5990_v7  ;;  %v6052_v6 = vld [vmem:[#allocation7 + $0x28c] ss:$16 sps:$4 sm:$0xff]   ;;  %v6047_v7 = vld [vmem:[#allocation7 + $0x280] ss:$16 sps:$4 sm:$0xff]  }
 0x229   :  { %4107 = vmatprep.subr.bf16.mxu0 %v5995_v8  ;;  %4189 = vmatprep.subr.bf16.mxu1 %v5998_v9  ;;  %v6050_v8 = vld [vmem:[#allocation7 + $0x288] ss:$16 sps:$4 sm:$0xff]   ;;  %v6055_v9 = vld [vmem:[#allocation7 + $0x2a4] ss:$16 sps:$4 sm:$0xff]  }
 0x22c   :  { %4108 = vmatpush1.bf16.msra.mxu0 %v5993_v12  ;;  %4190 = vmatpush1.bf16.msra.mxu1 %v5996_v13  ;;  %v6058_v12 = vld [vmem:[#allocation7 + $0x2ac] ss:$16 sps:$4 sm:$0xff]   ;;  %v6053_v13 = vld [vmem:[#allocation7 + $0x2a0] ss:$16 sps:$4 sm:$0xff]  }
 0x22d   :  { %4109 = vmatprep.subr.bf16.mxu0 %v6001_v10  ;;  %4191 = vmatprep.subr.bf16.mxu1 %v6004_v11  ;;  %v6056_v10 = vld [vmem:[#allocation7 + $0x2a8] ss:$16 sps:$4 sm:$0xff]   ;;  %v6061_v11 = vld [vmem:[#allocation7 + $0x2c4] ss:$16 sps:$4 sm:$0xff]  }
 0x230   :  { %4110 = vmatpush1.bf16.msra.mxu0 %v5999_v14  ;;  %4192 = vmatpush1.bf16.msra.mxu1 %v6002_v15  ;;  %v6064_v14 = vld [vmem:[#allocation7 + $0x2cc] ss:$16 sps:$4 sm:$0xff]   ;;  %v6059_v15 = vld [vmem:[#allocation7 + $0x2c0] ss:$16 sps:$4 sm:$0xff]  }
 0x231   :  { %4111 = vmatprep.subr.bf16.mxu0 %v6007_v16  ;;  %4193 = vmatprep.subr.bf16.mxu1 %v6010_v17  ;;  %v6062_v16 = vld [vmem:[#allocation7 + $0x2c8] ss:$16 sps:$4 sm:$0xff]   ;;  %v6067_v17 = vld [vmem:[#allocation7 + $0x2e4] ss:$16 sps:$4 sm:$0xff]  }
 0x234   :  { %4112 = vmatpush1.bf16.msra.mxu0 %v6005_v18  ;;  %4194 = vmatpush1.bf16.msra.mxu1 %v6008_v19  ;;  %v6070_v18 = vld [vmem:[#allocation7 + $0x2ec] ss:$16 sps:$4 sm:$0xff]   ;;  %v6065_v19 = vld [vmem:[#allocation7 + $0x2e0] ss:$16 sps:$4 sm:$0xff]  }
 0x235   :  { %4113 = vmatprep.subr.bf16.mxu0 %v6013_v20  ;;  %4195 = vmatprep.subr.bf16.mxu1 %v6016_v21  ;;  %v6068_v20 = vld [vmem:[#allocation7 + $0x2e8] ss:$16 sps:$4 sm:$0xff]   ;;  %v6073_v21 = vld [vmem:[#allocation7 + $0x304] ss:$16 sps:$4 sm:$0xff]  }
 0x238   :  { %4114 = vmatpush1.bf16.msra.mxu0 %v6011_v22  ;;  %4196 = vmatpush1.bf16.msra.mxu1 %v6014_v23  ;;  %v6076_v22 = vld [vmem:[#allocation7 + $0x30c] ss:$16 sps:$4 sm:$0xff]   ;;  %v6071_v23 = vld [vmem:[#allocation7 + $0x300] ss:$16 sps:$4 sm:$0xff]  }
 0x239   :  { %4115 = vmatprep.subr.bf16.mxu0 %v6019_v24  ;;  %4197 = vmatprep.subr.bf16.mxu1 %v6022_v25  ;;  %v6074_v24 = vld [vmem:[#allocation7 + $0x308] ss:$16 sps:$4 sm:$0xff]   ;;  %v6079_v25 = vld [vmem:[#allocation7 + $0x324] ss:$16 sps:$4 sm:$0xff]  }
 0x23c   :  { %4116 = vmatpush1.bf16.msra.mxu0 %v6017_v26  ;;  %4198 = vmatpush1.bf16.msra.mxu1 %v6020_v27  ;;  %v6082_v26 = vld [vmem:[#allocation7 + $0x32c] ss:$16 sps:$4 sm:$0xff]   ;;  %v6077_v27 = vld [vmem:[#allocation7 + $0x320] ss:$16 sps:$4 sm:$0xff]  }
 0x23d   :  { %4126 = vmatprep.subr.bf16.mxu0 %v6025_v28  ;;  %4208 = vmatprep.subr.bf16.mxu1 %v6028_v53  ;;  %v6080_v28 = vld [vmem:[#allocation7 + $0x328] ss:$16 sps:$4 sm:$0xff]   ;;  %v6085_v53 = vld [vmem:[#allocation7 + $0x344] ss:$16 sps:$4 sm:$0xff]  }
 0x2d2   :  { %v2993_v38 = vpop.f32.mrb[0].mxu0  ;;  %v6557_v39 = vpop.f32.mrb[0].mxu1 }
 0x2d3   :  { %v5228_v40 = vadd.f32 %v2993_v38, %v692_v33  ;;  %v2995_v41 = vpop.f32.mrb[1].mxu0  ;;  %v3282_v42 = vpop.f32.mrb[1].mxu1  ;;  %v6088_v33 = vld [vmem:[#allocation7 + $0x34c] ss:$16 sps:$4 sm:$0xff]   ;;  %v6091_v38 = vld [vmem:[#allocation7 + $0x364] ss:$16 sps:$4 sm:$0xff]  }
 0x2d4   :  { %v5229_v43 = vadd.f32 %v2995_v41, %v696_v34  ;;  %v5231_v44 = vadd.f32 %v3282_v42, %v704_v35  ;;  %v2997_v45 = vpop.f32.mrb[2].mxu0  ;;  %v3284_v36 = vpop.f32.mrb[2].mxu1  ;;  %v6083_v34 = vld [vmem:[#allocation7 + $0x340] ss:$16 sps:$4 sm:$0xff]   ;;  %v6086_v35 = vld [vmem:[#allocation7 + $0x348] ss:$16 sps:$4 sm:$0xff]  }
 0x2d5   :  { %v3287_v37 = vmax.f32 %v5228_v40, 0.0  ;;  %v2998_v49 = vpop.f32.mrb[3].mxu0  ;;  %v3285_v50 = vpop.f32.mrb[3].mxu1  ;;  %v6094_v40 = vld [vmem:[#allocation7 + $0x36c] ss:$16 sps:$4 sm:$0xff]  }
 0x2d6   :  { %v3288_v51 = vmax.f32 %v5229_v43, 0.0  ;;  %v3290_v52 = vmax.f32 %v5231_v44, 0.0  ;;  %v6089_v41 = vld [vmem:[#allocation7 + $0x360] ss:$16 sps:$4 sm:$0xff]   ;;  %v6092_v42 = vld [vmem:[#allocation7 + $0x368] ss:$16 sps:$4 sm:$0xff]  }
 0x2d7   :  { %v3291_v57 = vpack.c.bf16 %v3287_v37, %v3287_v37  ;;  %v6097_v43 = vld [vmem:[#allocation7 + $0x384] ss:$16 sps:$4 sm:$0xff]   ;;  %v6100_v44 = vld [vmem:[#allocation7 + $0x38c] ss:$16 sps:$4 sm:$0xff]   ;;  %v6095_v45 = vld [vmem:[#allocation7 + $0x380] ss:$16 sps:$4 sm:$0xff]  }
 0x2d8   :  { %v3292_v54 = vpack.c.bf16 %v3288_v51, %v3288_v51  ;;  %v3294_v60 = vpack.c.bf16 %v3290_v52, %v3290_v52  ;;  %v6098_v36 = vld [vmem:[#allocation7 + $0x388] ss:$16 sps:$4 sm:$0xff]   ;;  %v699_v37 = vsub.s32 2, %v6442_v46  ;;  %v6103_v49 = vld [vmem:[#allocation7 + $0x3a4] ss:$16 sps:$4 sm:$0xff]  }
 0x2d9   :  { %v6106_v50 = vld [vmem:[#allocation7 + $0x3ac] ss:$16 sps:$4 sm:$0xff]   ;;  %v6101_v51 = vld [vmem:[#allocation7 + $0x3a0] ss:$16 sps:$4 sm:$0xff]   ;;  %v6104_v52 = vld [vmem:[#allocation7 + $0x3a8] ss:$16 sps:$4 sm:$0xff]  }
 0x2da   :  { %4117 = vmatprep.mubr.bf16.mxu0 %v3292_v54  ;;  %4199 = vmatprep.mubr.bf16.mxu1 %v3292_v54  ;;  %v700_v54 = vrot.slane %v6544_v30, %v699_v37  ;;  %v6119_v30 = vld [vmem:[#allocation10 + $0x40] sm:$0xff]  }
 0x2db   :  { %4118 = vmatmul.mubr.bf16.vlgmr.msra.gmra.mrb[4].mxu0 %v3291_v57  ;;  %4200 = vmatmul.mubr.bf16.vlgmr.msra.gmra.mrb[4].mxu1 %v3291_v57  ;;  %v6107_v57 = vld [vmem:[#allocation7 + $0x3c0] ss:$16 sps:$4 sm:$0xff]  }
 0x2dc   :  { %4127 = vmatpush1.bf16.msra.mxu0 %v6023_v55  ;;  %4209 = vmatpush1.bf16.msra.mxu1 %v6026_v56  ;;  %v6109_v55 = vld [vmem:[#allocation7 + $0x3c4] ss:$16 sps:$4 sm:$0xff]   ;;  %v6112_v56 = vld [vmem:[#allocation7 + $0x3cc] ss:$16 sps:$4 sm:$0xff]  }
 0x2dd   :  { %4158 = vmatprep.mubr.bf16.mxu0 %v3294_v60  ;;  %4240 = vmatprep.mubr.bf16.mxu1 %v3294_v60  ;;  %v6115_v60 = vld [vmem:[#allocation7 + $0x3e4] ss:$16 sps:$4 sm:$0xff]  }
 0x2de   :  { %4128 = vmatprep.subr.bf16.mxu0 %v6031_v58  ;;  %4210 = vmatprep.subr.bf16.mxu1 %v6034_v59  ;;  %v6110_v58 = vld [vmem:[#allocation7 + $0x3c8] ss:$16 sps:$4 sm:$0xff]   ;;  %v5230_v59 = vadd.f32 %v6557_v39, %v700_v54  ;;  %v6123_v39 = vld [vmem:[#allocation10 + $0x48] sm:$0xff]  }
 0x2e0   :  { %4129 = vmatpush1.bf16.msra.mxu0 %v6029_v61  ;;  %4211 = vmatpush1.bf16.msra.mxu1 %v6032_v62  ;;  %v6118_v61 = vld [vmem:[#allocation7 + $0x3ec] ss:$16 sps:$4 sm:$0xff]   ;;  %v6113_v62 = vld [vmem:[#allocation7 + $0x3e0] ss:$16 sps:$4 sm:$0xff]  }
 0x2e1   :  { %4130 = vmatprep.subr.bf16.mxu0 %v6037_v63  ;;  %4212 = vmatprep.subr.bf16.mxu1 %v6040_v0  ;;  %v6116_v63 = vld [vmem:[#allocation7 + $0x3e8] ss:$16 sps:$4 sm:$0xff]   ;;  %v3289_v0 = vmax.f32 %v5230_v59, 0.0 }
 0x2e4   :  { %4131 = vmatpush1.bf16.msra.mxu0 %v6035_v1  ;;  %4213 = vmatpush1.bf16.msra.mxu1 %v6038_v2  ;;  %v6120_v1 = vld [vmem:[#allocation10 + $0xc0] sm:$0xff]  }
 0x2e5   :  { %4132 = vmatprep.subr.bf16.mxu0 %v6043_v3  ;;  %4214 = vmatprep.subr.bf16.mxu1 %v6046_v47  ;;  %v6121_v2 = vld [vmem:[#allocation10] sm:$0xff]   ;;  %v3293_v47 = vpack.c.bf16 %v3289_v0, %v3289_v0 }
 0x2e6   :  { %v6122_v3 = vld [vmem:[#allocation10 + $0x80] sm:$0xff]  }
 0x2e8   :  { %4133 = vmatpush1.bf16.msra.mxu0 %v6041_v48  ;;  %4215 = vmatpush1.bf16.msra.mxu1 %v6044_v4  ;;  %v6124_v48 = vld [vmem:[#allocation10 + $0xc8] sm:$0xff]  }
 0x2e9   :  { %4134 = vmatprep.subr.bf16.mxu0 %v6049_v5  ;;  %4216 = vmatprep.subr.bf16.mxu1 %v6052_v6  ;;  %v6125_v4 = vld [vmem:[#allocation10 + $0x8] sm:$0xff]   ;;  %v6127_v6 = vld [vmem:[#allocation10 + $0x50] sm:$0xff]  }
 0x2ea   :  { %v6126_v5 = vld [vmem:[#allocation10 + $0x88] sm:$0xff]  }
 0x2ec   :  { %4135 = vmatpush1.bf16.msra.mxu0 %v6047_v7  ;;  %4217 = vmatpush1.bf16.msra.mxu1 %v6050_v8  ;;  %v6128_v7 = vld [vmem:[#allocation10 + $0xd0] sm:$0xff]  }
 0x2ed   :  { %4136 = vmatprep.subr.bf16.mxu0 %v6055_v9  ;;  %4218 = vmatprep.subr.bf16.mxu1 %v6058_v12  ;;  %v6129_v8 = vld [vmem:[#allocation10 + $0x10] sm:$0xff]   ;;  %v6131_v12 = vld [vmem:[#allocation10 + $0x58] sm:$0xff]  }
 0x2ee   :  { %v6130_v9 = vld [vmem:[#allocation10 + $0x90] sm:$0xff]  }
 0x2f0   :  { %4137 = vmatpush1.bf16.msra.mxu0 %v6053_v13  ;;  %4219 = vmatpush1.bf16.msra.mxu1 %v6056_v10  ;;  %v6132_v13 = vld [vmem:[#allocation10 + $0xd8] sm:$0xff]  }
 0x2f1   :  { %4138 = vmatprep.subr.bf16.mxu0 %v6061_v11  ;;  %4220 = vmatprep.subr.bf16.mxu1 %v6064_v14  ;;  %v6133_v10 = vld [vmem:[#allocation10 + $0x18] sm:$0xff]   ;;  %v6135_v14 = vld [vmem:[#allocation10 + $0x60] sm:$0xff]  }
 0x2f2   :  { %v6134_v11 = vld [vmem:[#allocation10 + $0x98] sm:$0xff]  }
 0x2f4   :  { %4139 = vmatpush1.bf16.msra.mxu0 %v6059_v15  ;;  %4221 = vmatpush1.bf16.msra.mxu1 %v6062_v16  ;;  %v6136_v15 = vld [vmem:[#allocation10 + $0xe0] sm:$0xff]  }
 0x2f5   :  { %4140 = vmatprep.subr.bf16.mxu0 %v6067_v17  ;;  %4222 = vmatprep.subr.bf16.mxu1 %v6070_v18  ;;  %v6137_v16 = vld [vmem:[#allocation10 + $0x20] sm:$0xff]   ;;  %v6139_v18 = vld [vmem:[#allocation10 + $0x68] sm:$0xff]  }
 0x2f6   :  { %v6138_v17 = vld [vmem:[#allocation10 + $0xa0] sm:$0xff]  }
 0x2f8   :  { %4141 = vmatpush1.bf16.msra.mxu0 %v6065_v19  ;;  %4223 = vmatpush1.bf16.msra.mxu1 %v6068_v20  ;;  %v6140_v19 = vld [vmem:[#allocation10 + $0xe8] sm:$0xff]  }
 0x2f9   :  { %4142 = vmatprep.subr.bf16.mxu0 %v6073_v21  ;;  %4224 = vmatprep.subr.bf16.mxu1 %v6076_v22  ;;  %v6141_v20 = vld [vmem:[#allocation10 + $0x28] sm:$0xff]   ;;  %v6143_v22 = vld [vmem:[#allocation10 + $0x70] sm:$0xff]  }
 0x2fa   :  { %v6142_v21 = vld [vmem:[#allocation10 + $0xa8] sm:$0xff]  }
 0x2fc   :  { %4143 = vmatpush1.bf16.msra.mxu0 %v6071_v23  ;;  %4225 = vmatpush1.bf16.msra.mxu1 %v6074_v24  ;;  %v6144_v23 = vld [vmem:[#allocation10 + $0xf0] sm:$0xff]  }
 0x2fd   :  { %4144 = vmatprep.subr.bf16.mxu0 %v6079_v25  ;;  %4226 = vmatprep.subr.bf16.mxu1 %v6082_v26  ;;  %v6145_v24 = vld [vmem:[#allocation10 + $0x30] sm:$0xff]   ;;  %v6147_v26 = vld [vmem:[#allocation10 + $0x78] sm:$0xff]  }
 0x2fe   :  { %v6146_v25 = vld [vmem:[#allocation10 + $0xb0] sm:$0xff]  }
 0x300   :  { %4145 = vmatpush1.bf16.msra.mxu0 %v6077_v27  ;;  %4227 = vmatpush1.bf16.msra.mxu1 %v6080_v28  ;;  %v6148_v27 = vld [vmem:[#allocation10 + $0xf8] sm:$0xff]  }
 0x301   :  { %4146 = vmatprep.subr.bf16.mxu0 %v6085_v53  ;;  %4228 = vmatprep.subr.bf16.mxu1 %v6088_v33  ;;  %v6149_v28 = vld [vmem:[#allocation10 + $0x38] sm:$0xff]  }
 0x302   :  { %v6150_v53 = vld [vmem:[#allocation10 + $0xb8] sm:$0xff]  }
 0x303   :  { %v3423_v33 = vld [vmem:[#allocation8] sm:$0xf] }
 0x304   :  { %4147 = vmatpush1.bf16.msra.mxu0 %v6083_v34  ;;  %4229 = vmatpush1.bf16.msra.mxu1 %v6086_v35  ;;  %v3428_v34 = vrot.slane %v3423_v33, %v691_v29  ;;  %v3436_v35 = vrot.slane %v3423_v33, %v699_v37 }
 0x305   :  { %4148 = vmatprep.subr.bf16.mxu0 %v6091_v38  ;;  %4230 = vmatprep.subr.bf16.mxu1 %v6094_v40  ;;  %v3432_v38 = vrot.slane %v3423_v33, %v695_v31  ;;  %v3440_v40 = vrot.slane %v3423_v33, %v703_v32 }
 0x308   :  { %4149 = vmatpush1.bf16.msra.mxu0 %v6089_v41  ;;  %4231 = vmatpush1.bf16.msra.mxu1 %v6092_v42 }
 0x309   :  { %4150 = vmatprep.subr.bf16.mxu0 %v6097_v43  ;;  %4232 = vmatprep.subr.bf16.mxu1 %v6100_v44 }
 0x30c   :  { %4151 = vmatpush1.bf16.msra.mxu0 %v6095_v45  ;;  %4233 = vmatpush1.bf16.msra.mxu1 %v6098_v36 }
 0x30d   :  { %4152 = vmatprep.subr.bf16.mxu0 %v6103_v49  ;;  %4234 = vmatprep.subr.bf16.mxu1 %v6106_v50 }
 0x310   :  { %4153 = vmatpush1.bf16.msra.mxu0 %v6101_v51  ;;  %4235 = vmatpush1.bf16.msra.mxu1 %v6104_v52 }
 0x311   :  { %4154 = vmatprep.subr.bf16.mxu0 %v6109_v55  ;;  %4236 = vmatprep.subr.bf16.mxu1 %v6112_v56 }
 0x314   :  { %4155 = vmatpush1.bf16.msra.mxu0 %v6107_v57  ;;  %4237 = vmatpush1.bf16.msra.mxu1 %v6110_v58 }
 0x315   :  { %4156 = vmatprep.subr.bf16.mxu0 %v6115_v60  ;;  %4238 = vmatprep.subr.bf16.mxu1 %v6118_v61  ;;  %v5151_v61 = vld [vmem:[#allocation11] ss:$0 sm:$0xff] }
 0x318   :  { %4157 = vmatpush1.bf16.msra.mxu0 %v6113_v62  ;;  %4239 = vmatpush1.bf16.msra.mxu1 %v6116_v63 }
 0x319   :  { %5184 = vmatprep.subr.bf16.mxu0 %v6119_v30  ;;  %5206 = vmatprep.subr.bf16.mxu1 %v6120_v1 }
 0x31b   :  { %4159 = vmatmul.mubr.bf16.vlgmr.msra.gmra.mrb[4].mxu0 %v3293_v47  ;;  %4241 = vmatmul.mubr.bf16.vlgmr.msra.gmra.mrb[4].mxu1 %v3293_v47 }
 0x31c   :  { %5185 = vmatpush3.bf16.msra.mxu0 %v6121_v2  ;;  %5207 = vmatpush3.bf16.msra.mxu1 %v6122_v3 }
 0x31d   :  { %5186 = vmatprep.subr.bf16.mxu0 %v6123_v39  ;;  %5208 = vmatprep.subr.bf16.mxu1 %v6124_v48 }
 0x320   :  { %5187 = vmatpush3.bf16.msra.mxu0 %v6125_v4  ;;  %5209 = vmatpush3.bf16.msra.mxu1 %v6126_v5 }
 0x321   :  { %5188 = vmatprep.subr.bf16.mxu0 %v6127_v6  ;;  %5210 = vmatprep.subr.bf16.mxu1 %v6128_v7 }
 0x324   :  { %5189 = vmatpush3.bf16.msra.mxu0 %v6129_v8  ;;  %5211 = vmatpush3.bf16.msra.mxu1 %v6130_v9 }
 0x325   :  { %5190 = vmatprep.subr.bf16.mxu0 %v6131_v12  ;;  %5212 = vmatprep.subr.bf16.mxu1 %v6132_v13 }
 0x328   :  { %5191 = vmatpush3.bf16.msra.mxu0 %v6133_v10  ;;  %5213 = vmatpush3.bf16.msra.mxu1 %v6134_v11 }
 0x329   :  { %5192 = vmatprep.subr.bf16.mxu0 %v6135_v14  ;;  %5214 = vmatprep.subr.bf16.mxu1 %v6136_v15 }
 0x32c   :  { %5193 = vmatpush3.bf16.msra.mxu0 %v6137_v16  ;;  %5215 = vmatpush3.bf16.msra.mxu1 %v6138_v17 }
 0x32d   :  { %5194 = vmatprep.subr.bf16.mxu0 %v6139_v18  ;;  %5216 = vmatprep.subr.bf16.mxu1 %v6140_v19 }
 0x330   :  { %5195 = vmatpush3.bf16.msra.mxu0 %v6141_v20  ;;  %5217 = vmatpush3.bf16.msra.mxu1 %v6142_v21 }
 0x331   :  { %5196 = vmatprep.subr.bf16.mxu0 %v6143_v22  ;;  %5218 = vmatprep.subr.bf16.mxu1 %v6144_v23 }
 0x334   :  { %5197 = vmatpush3.bf16.msra.mxu0 %v6145_v24  ;;  %5219 = vmatpush3.bf16.msra.mxu1 %v6146_v25 }
 0x335   :  { %5198 = vmatprep.subr.bf16.mxu0 %v6147_v26  ;;  %5220 = vmatprep.subr.bf16.mxu1 %v6148_v27 }
 0x338   :  { %5199 = vmatpush3.bf16.msra.mxu0 %v6149_v28  ;;  %5221 = vmatpush3.bf16.msra.mxu1 %v6150_v53 }
 0x3ee   :  { %v4160_v41 = vpop.f32.mrb[4].mxu0  ;;  %v4242_v42 = vpop.f32.mrb[4].mxu1 }
 0x3ef   :  { %v5232_v43 = vadd.f32 %v4160_v41, %v3428_v34  ;;  %v5234_v44 = vadd.f32 %v4242_v42, %v3436_v35  ;;  %v4162_v45 = vpop.f32.mrb[5].mxu0  ;;  %v4244_v36 = vpop.f32.mrb[5].mxu1 }
 0x3f0   :  { %v5233_v49 = vadd.f32 %v4162_v45, %v3432_v38  ;;  %v5235_v50 = vadd.f32 %v4244_v36, %v3440_v40  ;;  %v4164_v51 = vpop.f32.mrb[6].mxu0  ;;  %v4246_v52 = vpop.f32.mrb[6].mxu1 }
 0x3f1   :  { %v4249_v29 = vmax.f32 %v5232_v43, 0.0  ;;  %v4251_v54 = vmax.f32 %v5234_v44, 0.0  ;;  %v4165_v55 = vpop.f32.mrb[7].mxu0  ;;  %v4247_v37 = vpop.f32.mrb[7].mxu1 }
 0x3f2   :  { %v4250_v56 = vmax.f32 %v5233_v49, 0.0  ;;  %v4252_v57 = vmax.f32 %v5235_v50, 0.0 }
 0x3f3   :  { %v4253_v46 = vpack.c.bf16 %v4249_v29, %v4249_v29  ;;  %v4255_v32 = vpack.c.bf16 %v4251_v54, %v4251_v54 }
 0x3f4   :  { %v4254_v31 = vpack.c.bf16 %v4250_v56, %v4250_v56  ;;  %v4256_v58 = vpack.c.bf16 %v4252_v57, %v4252_v57 }
 0x3f6   :  { %4552 = vmatprep.mubr.bf16.mxu0 %v4254_v31  ;;  %4592 = vmatprep.mubr.bf16.mxu1 %v4256_v58 }
 0x3f7   :  { %4553 = vmatmul.mubr.bf16.vlgmr.msra.gmra.mrb[8].mxu0 %v4253_v46  ;;  %4593 = vmatmul.mubr.bf16.vlgmr.msra.gmra.mrb[8].mxu1 %v4255_v32 }
 0x4ca   :  { %v5200_v59 = vpop.f32.mrb[8].mxu0  ;;  %v5222_v60 = vpop.f32.mrb[8].mxu1 }
 0x4cb   :  { %v5201_v62 = vpop.f32.mrb[9].mxu0  ;;  %v5223_v63 = vpop.f32.mrb[9].mxu1 }
 0x4cc   :  { %v5202_v0 = vadd.f32 %v5201_v62, %v5200_v59  ;;  %v5224_v30 = vadd.f32 %v5223_v63, %v5222_v60  ;;  %v5203_v1 = vpop.f32.mrb[10].mxu0  ;;  %v5225_v2 = vpop.f32.mrb[10].mxu1 }
 0x4cd   :  { %v5204_v3 = vpop.f32.mrb[11].mxu0  ;;  %v5226_v47 = vpop.f32.mrb[11].mxu1 }
 0x4ce   :  { %v4555_v39 = vadd.f32 %v5202_v0, %v5151_v61 }
 0x4d0   :  { %v4595_v48 = vadd.f32 %v5224_v30, %v4555_v39 }
 0x4d2   :  { %4600 = vst [vmem:[#allocation13] sm:$0xff] %v4595_v48 }
 0x4d3   :  { %4605 = vsyncadd [#allocation4], 96  ;;  %s6327_s0 = smov [#allocation13]  }
 0x4d4   :  { %s4606_s23 = sshll.u32 %s6327_s0, 4  ;;  %s4607_s23 = int_to_ptr.vmem [resolvable:$true] %s4606_s23 }
 0x4d5   :  { %s6283_s6 = scalar_lea.vmem %s4607_s23, 32  ;;  %s6287_s1 = scalar_lea.vmem %s4607_s23, 128 }
 0x4d6   :  { %p6284_p6 = scmp.ne.s32.totalorder %s4607_s23, %s6283_s6  ;;  %p6288_p7 = scmp.lt.s32.totalorder %s4607_s23, %s4607_s23 }
 0x4d7   :  { %p6289_p8 = scmp.lt.s32.totalorder %s6287_s1, %s6283_s6 }
 0x4d9   :  { %p6290_p9 = por %p6289_p8, %p6288_p7 }
 0x4db   :  { %p6291_p10 = pnand %p6290_p9, %p6284_p6 }
 0x4dd   :  { %6294 = shalt.err (!%p6291_p10)
}
 0x4de   :  { %s6295_s26 = scalar_lea.hbm %s6591_s7, 32 }
 0x4df   :  { %p6296_p11 = scmp.ne.s32.totalorder %s6591_s7, %s6295_s26  ;;  %p6299_p12 = scmp.lt.u32.totalorder %s6295_s26, %s6591_s7 }
 0x4e1   :  { %p6301_p13 = pnand %p6299_p12, %p6296_p11 }
 0x4e3   :  { %6304 = shalt.err (!%p6301_p13)
}
 0x4e4   :  { %s6328_s9 = smov 32   ;;  %s6329_s10 = smov 2  }
 0x4e5   :  { %4612 = dma.vmem_to_hbm [thread:$0]  %s4607_s23, 32, %s6591_s7, [#allocation4], %s6328_s9, %s6328_s9, %s6329_s10  }
 0x4e6   :  { %6313 = dma.done.wait [#allocation4], 128  }
 0x4e7   :  { %6314 = vsyncadd [#allocation4], 4294967168 }
 0x4e8   :  { %4616 = vsyncpa [#allocation3], 1 }
 0x4e9   :  { %4617 = vsyncpa [#allocation6], 1 }
 0x4ea   :  { %4618 = vsyncpa [#allocation9], 1 }
 0x4eb   :  { %4619 = vsyncpa [#allocation12], 1 }
 0x4ec   :  { %4620 = vsyncpa [#allocation4], 1 }

</bundles_post_ra>
